<compile_context>
chip_gen: v6e
topology: v6e:2x2x1
jax: 0.10.0
libtpu: 0.0.40
codegen_flags: <defaults>
</compile_context>

<pallas_src>
import functools

import jax
import jax.numpy as jnp
import numpy as np
from jax.experimental import pallas as pl
from jax.experimental.pallas import tpu as pltpu

_LANE = 128


def _round_up(x, m):
    return ((x + m - 1) // m) * m


def _dwsep_kernel(xp_ref, dw_ref, pw_ref, b1_ref, b2_ref, o_ref, *,
                  TH, W_out, Cp, Cp_out, stride, mm_dtype):
    # xp_ref : (1, H+2, W+2, Cp)   padded NHWC image (resident across the row-tile axis)
    # dw_ref : (3, 3, Cp)          depthwise weights, BN1 scale pre-folded (f32)
    # pw_ref : (Cp, Cp_out)        pointwise weights, BN2 scale pre-folded (mm_dtype)
    # b1_ref : (1, Cp)             folded BN1 bias
    # b2_ref : (1, Cp_out)         folded BN2 bias
    # o_ref  : (1, TH, W_out, Cp_out)
    h_idx = pl.program_id(1)
    row0 = pl.multiple_of(h_idx * (TH * stride), TH * stride)

    rows_needed = (TH - 1) * stride + 3          # output rows TH -> input rows incl. halo
    w_span = (W_out - 1) * stride + 1
    h_span = (TH - 1) * stride + 1

    # Row-tile of the padded input (dynamic start along H, static size).
    xrows = xp_ref[0, pl.ds(row0, rows_needed), :, :]          # (rows_needed, W+2, Cp) f32

    dwf = dw_ref[...]                                          # (3, 3, Cp) f32

    # Precompute the 3 W-shifted (and W-strided) views once: 3 relayouts, not 9.
    xw = [xrows[:, dx:dx + w_span:stride, :] for dx in range(3)]

    # 3x3 depthwise conv as 9 broadcast-MACs on the VPU (lane-dense channels).
    acc = xw[0][0:h_span:stride, :, :] * dwf[0, 0, :]          # seed with tap (0, 0)
    for dy in range(3):
        for dx in range(3):
            if dy == 0 and dx == 0:
                continue
            patch = xw[dx][dy:dy + h_span:stride, :, :]        # (TH, W_out, Cp)
            acc = acc + patch * dwf[dy, dx, :]

    # BN1 (scale already folded into dw) -> bias add + ReLU6.
    hact = jnp.clip(acc + b1_ref[0], 0.0, 6.0)

    # Pointwise 1x1 conv as an MXU matmul over the lane-dense channel axis.
    y = jnp.dot(hact.astype(mm_dtype).reshape(TH * W_out, Cp), pw_ref[...],
                preferred_element_type=jnp.float32)            # (TH*W_out, Cp_out)

    # BN2 (scale already folded into pw) -> bias add + ReLU6.
    y = jnp.clip(y + b2_ref[0], 0.0, 6.0)

    o_ref[0] = y.reshape(TH, W_out, Cp_out).astype(o_ref.dtype)


def depthwise_separable_conv(x_nchw, dw_w, pw_w,
                             bn1_gamma, bn1_beta, bn1_mean, bn1_var,
                             bn2_gamma, bn2_beta, bn2_mean, bn2_var,
                             *, stride=1, eps=1e-5,
                             matmul_dtype=jnp.float32,   # jnp.bfloat16 -> 2x MXU on v6e/v7x
                             row_tile=8):
    """x_nchw: (N, C_in, H, W) float32. Returns (N, C_out, H_out, W_out)."""
    N, C_in, H, W = x_nchw.shape
    C_out = pw_w.shape[0]
    H_out = (H + 2 - 3) // stride + 1
    W_out = (W + 2 - 3) // stride + 1

    Cp = _round_up(C_in, _LANE)                   # lane-dense input channels
    Cp_out = _round_up(C_out, _LANE)              # lane-dense output channels

    # Row tile: largest divisor of H_out that is <= row_tile.
    TH = max(1, min(row_tile, H_out))
    while H_out % TH:
        TH -= 1
    n_h = H_out // TH

    # ---- glue: layout, padding, BN folding (plain JAX, one-time) ----
    # TODO(synk): if the surrounding model is NHWC these transposes/pads can be dropped.
    x_nhwc = jnp.transpose(x_nchw, (0, 2, 3, 1))                       # (N,H,W,Cin)
    x_pad = jnp.pad(x_nhwc, ((0, 0), (1, 1), (1, 1), (0, Cp - C_in)))  # (N,H+2,W+2,Cp)

    s1 = bn1_gamma / jnp.sqrt(bn1_var + eps)
    b1 = bn1_beta - bn1_mean * s1
    s2 = bn2_gamma / jnp.sqrt(bn2_var + eps)
    b2 = bn2_beta - bn2_mean * s2

    # Depthwise weight (C_in,1,3,3) -> (3,3,C_in); fold BN1 scale; pad channels.
    dw = jnp.transpose(dw_w[:, 0, :, :], (1, 2, 0)) * s1[None, None, :]
    dw = jnp.pad(dw, ((0, 0), (0, 0), (0, Cp - C_in))).astype(jnp.float32)

    # Pointwise weight (C_out,C_in,1,1) -> (C_in,C_out); fold BN2 scale; pad both channel dims.
    pw = jnp.transpose(pw_w[:, :, 0, 0], (1, 0)) * s2[None, :]
    pw = jnp.pad(pw, ((0, Cp - C_in), (0, Cp_out - C_out))).astype(matmul_dtype)

    b1p = jnp.pad(b1, (0, Cp - C_in)).reshape(1, Cp).astype(jnp.float32)
    b2p = jnp.pad(b2, (0, Cp_out - C_out)).reshape(1, Cp_out).astype(jnp.float32)

    kernel = functools.partial(_dwsep_kernel, TH=TH, W_out=W_out,
                               Cp=Cp, Cp_out=Cp_out, stride=stride,
                               mm_dtype=matmul_dtype)

    out_nhwc = pl.pallas_call(
        kernel,
        out_shape=jax.ShapeDtypeStruct((N, H_out, W_out, Cp_out), x_nchw.dtype),
        grid_spec=pltpu.PrefetchScalarGridSpec(
            num_scalar_prefetch=0,
            grid=(N, n_h),
            in_specs=[
                # Padded image: same block across the row-tile axis -> stays in VMEM.
                pl.BlockSpec((1, H + 2, W + 2, Cp), lambda n, h: (n, 0, 0, 0)),
                pl.BlockSpec((3, 3, Cp), lambda n, h: (0, 0, 0)),
                pl.BlockSpec((Cp, Cp_out), lambda n, h: (0, 0)),
                pl.BlockSpec((1, Cp), lambda n, h: (0, 0)),
                pl.BlockSpec((1, Cp_out), lambda n, h: (0, 0)),
            ],
            out_specs=pl.BlockSpec((1, TH, W_out, Cp_out), lambda n, h: (n, h, 0, 0)),
        ),
        compiler_params=pltpu.CompilerParams(
            dimension_semantics=("parallel", "arbitrary"),
            vmem_limit_bytes=48 * 1024 * 1024,
        ),
    )(x_pad, dw, pw, b1p, b2p)

    out_nhwc = out_nhwc[..., :C_out]                    # drop channel padding
    return jnp.transpose(out_nhwc, (0, 3, 1, 2))        # back to NCHW


def _reference(x_nchw, dw_w, pw_w,
               bn1_gamma, bn1_beta, bn1_mean, bn1_var,
               bn2_gamma, bn2_beta, bn2_mean, bn2_var, *, stride=1, eps=1e-5):
    """Pure-JAX reference matching the PyTorch module semantics (inference BN)."""
    N, C_in, H, W = x_nchw.shape
    H_out = (H + 2 - 3) // stride + 1
    W_out = (W + 2 - 3) // stride + 1
    x = jnp.transpose(x_nchw, (0, 2, 3, 1))
    xp = jnp.pad(x, ((0, 0), (1, 1), (1, 1), (0, 0)))
    dw = jnp.transpose(dw_w[:, 0, :, :], (1, 2, 0))
    acc = jnp.zeros((N, H_out, W_out, C_in), jnp.float32)
    for dy in range(3):
        for dx in range(3):
            acc = acc + xp[:, dy:dy + (H_out - 1) * stride + 1:stride,
                           dx:dx + (W_out - 1) * stride + 1:stride, :] * dw[dy, dx, :]
    s1 = bn1_gamma / jnp.sqrt(bn1_var + eps)
    b1 = bn1_beta - bn1_mean * s1
    h = jnp.clip(acc * s1 + b1, 0.0, 6.0)
    pw = jnp.transpose(pw_w[:, :, 0, 0], (1, 0))
    y = jnp.einsum("nhwc,cd->nhwd", h, pw)
    s2 = bn2_gamma / jnp.sqrt(bn2_var + eps)
    b2 = bn2_beta - bn2_mean * s2
    y = jnp.clip(y * s2 + b2, 0.0, 6.0)
    return jnp.transpose(y, (0, 3, 1, 2))


if __name__ == "__main__":
    key = jax.random.PRNGKey(0)
    N, C_in, C_out, H, W = 2, 4, 8, 16, 16
    stride = 1

    k = jax.random.split(key, 6)
    x = jax.random.normal(k[0], (N, C_in, H, W), jnp.float32)
    dw_w = jax.random.normal(k[1], (C_in, 1, 3, 3), jnp.float32) * 0.2
    pw_w = jax.random.normal(k[2], (C_out, C_in, 1, 1), jnp.float32) * 0.2

    bn1_gamma = jax.random.uniform(k[3], (C_in,), jnp.float32, 0.5, 1.5)
    bn1_beta = jax.random.normal(k[4], (C_in,), jnp.float32) * 0.1
    bn1_mean = jnp.zeros((C_in,), jnp.float32)
    bn1_var = jnp.ones((C_in,), jnp.float32)

    bn2_gamma = jax.random.uniform(k[5], (C_out,), jnp.float32, 0.5, 1.5)
    bn2_beta = jnp.zeros((C_out,), jnp.float32)
    bn2_mean = jnp.zeros((C_out,), jnp.float32)
    bn2_var = jnp.ones((C_out,), jnp.float32)

    out = depthwise_separable_conv(
        x, dw_w, pw_w,
        bn1_gamma, bn1_beta, bn1_mean, bn1_var,
        bn2_gamma, bn2_beta, bn2_mean, bn2_var,
        stride=stride)
    out = jax.block_until_ready(out)

    ref = _reference(
        x, dw_w, pw_w,
        bn1_gamma, bn1_beta, bn1_mean, bn1_var,
        bn2_gamma, bn2_beta, bn2_mean, bn2_var,
        stride=stride)
    np.testing.assert_allclose(np.asarray(out), np.asarray(ref), rtol=2e-5, atol=2e-5)

    assert out.shape == (N, C_out, H, W)
    print("KERNEL_OK")
</pallas_src>

<mosaic_0001>
module attributes {stable_mosaic.version = 11 : i64} {
  func.func @_dwsep_kernel(%arg0: i32, %arg1: i32, %arg2: memref<1x18x18x128xf32, #tpu.memory_space<vmem>>, %arg3: memref<3x3x128xf32, #tpu.memory_space<vmem>>, %arg4: memref<128x128xf32, #tpu.memory_space<vmem>>, %arg5: memref<1x128xf32, #tpu.memory_space<vmem>>, %arg6: memref<1x128xf32, #tpu.memory_space<vmem>>, %arg7: memref<1x8x16x128xf32, #tpu.memory_space<vmem>>) attributes {dimension_semantics = [#tpu.dimension_semantics<parallel>, #tpu.dimension_semantics<arbitrary>], iteration_bounds = array<i64: 2, 2>, scalar_prefetch = 0 : i64, scratch_operands = 0 : i64, tpu.core_type = #tpu.core_type<tc>, window_params = [{transform_indices = @transform_0, window_bounds = array<i64: 1, 18, 18, 128>}, {pipeline_mode = #tpu.pipeline_mode<synchronous>, transform_indices = @transform_1, window_bounds = array<i64: 3, 3, 128>}, {pipeline_mode = #tpu.pipeline_mode<synchronous>, transform_indices = @transform_2, window_bounds = array<i64: 128, 128>}, {pipeline_mode = #tpu.pipeline_mode<synchronous>, transform_indices = @transform_3, window_bounds = array<i64: 1, 128>}, {pipeline_mode = #tpu.pipeline_mode<synchronous>, transform_indices = @transform_4, window_bounds = array<i64: 1, 128>}, {transform_indices = @transform_5, window_bounds = array<i64: 1, 8, 16, 128>}]} {
    %c8_i32 = arith.constant 8 : i32
    %0 = arith.muli %arg1, %c8_i32 : i32
    %1 = tpu.assume_multiple %0, 8 : i32
    %c0 = arith.constant 0 : index
    %2 = arith.index_cast %1 : i32 to index
    %c0_0 = arith.constant 0 : index
    %c0_1 = arith.constant 0 : index
    %3 = vector.load %arg2[%c0, %2, %c0_0, %c0_1] : memref<1x18x18x128xf32, #tpu.memory_space<vmem>>, vector<1x10x18x128xf32>
    %4 = vector.shape_cast %3 : vector<1x10x18x128xf32> to vector<10x18x128xf32>
    %c0_2 = arith.constant 0 : index
    %c0_3 = arith.constant 0 : index
    %c0_4 = arith.constant 0 : index
    %5 = vector.load %arg3[%c0_2, %c0_3, %c0_4] : memref<3x3x128xf32, #tpu.memory_space<vmem>>, vector<3x3x128xf32>
    %6 = vector.extract_strided_slice %4 {offsets = [0, 0, 0], sizes = [10, 16, 128], strides = [1, 1, 1]} : vector<10x18x128xf32> to vector<10x16x128xf32>
    %7 = vector.extract_strided_slice %4 {offsets = [0, 1, 0], sizes = [10, 16, 128], strides = [1, 1, 1]} : vector<10x18x128xf32> to vector<10x16x128xf32>
    %8 = vector.extract_strided_slice %4 {offsets = [0, 2, 0], sizes = [10, 16, 128], strides = [1, 1, 1]} : vector<10x18x128xf32> to vector<10x16x128xf32>
    %9 = vector.extract_strided_slice %6 {offsets = [0, 0, 0], sizes = [8, 16, 128], strides = [1, 1, 1]} : vector<10x16x128xf32> to vector<8x16x128xf32>
    %10 = vector.extract_strided_slice %5 {offsets = [0, 0, 0], sizes = [1, 1, 128], strides = [1, 1, 1]} : vector<3x3x128xf32> to vector<1x1x128xf32>
    %11 = vector.shape_cast %10 : vector<1x1x128xf32> to vector<128xf32>
    %12 = vector.shape_cast %11 : vector<128xf32> to vector<1x1x128xf32>
    %13 = vector.broadcast %12 : vector<1x1x128xf32> to vector<8x16x128xf32>
    %14 = arith.mulf %9, %13 : vector<8x16x128xf32>
    %15 = vector.extract_strided_slice %7 {offsets = [0, 0, 0], sizes = [8, 16, 128], strides = [1, 1, 1]} : vector<10x16x128xf32> to vector<8x16x128xf32>
    %16 = vector.extract_strided_slice %5 {offsets = [0, 1, 0], sizes = [1, 1, 128], strides = [1, 1, 1]} : vector<3x3x128xf32> to vector<1x1x128xf32>
    %17 = vector.shape_cast %16 : vector<1x1x128xf32> to vector<128xf32>
    %18 = vector.shape_cast %17 : vector<128xf32> to vector<1x1x128xf32>
    %19 = vector.broadcast %18 : vector<1x1x128xf32> to vector<8x16x128xf32>
    %20 = arith.mulf %15, %19 : vector<8x16x128xf32>
    %21 = arith.addf %14, %20 : vector<8x16x128xf32>
    %22 = vector.extract_strided_slice %8 {offsets = [0, 0, 0], sizes = [8, 16, 128], strides = [1, 1, 1]} : vector<10x16x128xf32> to vector<8x16x128xf32>
    %23 = vector.extract_strided_slice %5 {offsets = [0, 2, 0], sizes = [1, 1, 128], strides = [1, 1, 1]} : vector<3x3x128xf32> to vector<1x1x128xf32>
    %24 = vector.shape_cast %23 : vector<1x1x128xf32> to vector<128xf32>
    %25 = vector.shape_cast %24 : vector<128xf32> to vector<1x1x128xf32>
    %26 = vector.broadcast %25 : vector<1x1x128xf32> to vector<8x16x128xf32>
    %27 = arith.mulf %22, %26 : vector<8x16x128xf32>
    %28 = arith.addf %21, %27 : vector<8x16x128xf32>
    %29 = vector.extract_strided_slice %6 {offsets = [1, 0, 0], sizes = [8, 16, 128], strides = [1, 1, 1]} : vector<10x16x128xf32> to vector<8x16x128xf32>
    %30 = vector.extract_strided_slice %5 {offsets = [1, 0, 0], sizes = [1, 1, 128], strides = [1, 1, 1]} : vector<3x3x128xf32> to vector<1x1x128xf32>
    %31 = vector.shape_cast %30 : vector<1x1x128xf32> to vector<128xf32>
    %32 = vector.shape_cast %31 : vector<128xf32> to vector<1x1x128xf32>
    %33 = vector.broadcast %32 : vector<1x1x128xf32> to vector<8x16x128xf32>
    %34 = arith.mulf %29, %33 : vector<8x16x128xf32>
    %35 = arith.addf %28, %34 : vector<8x16x128xf32>
    %36 = vector.extract_strided_slice %7 {offsets = [1, 0, 0], sizes = [8, 16, 128], strides = [1, 1, 1]} : vector<10x16x128xf32> to vector<8x16x128xf32>
    %37 = vector.extract_strided_slice %5 {offsets = [1, 1, 0], sizes = [1, 1, 128], strides = [1, 1, 1]} : vector<3x3x128xf32> to vector<1x1x128xf32>
    %38 = vector.shape_cast %37 : vector<1x1x128xf32> to vector<128xf32>
    %39 = vector.shape_cast %38 : vector<128xf32> to vector<1x1x128xf32>
    %40 = vector.broadcast %39 : vector<1x1x128xf32> to vector<8x16x128xf32>
    %41 = arith.mulf %36, %40 : vector<8x16x128xf32>
    %42 = arith.addf %35, %41 : vector<8x16x128xf32>
    %43 = vector.extract_strided_slice %8 {offsets = [1, 0, 0], sizes = [8, 16, 128], strides = [1, 1, 1]} : vector<10x16x128xf32> to vector<8x16x128xf32>
    %44 = vector.extract_strided_slice %5 {offsets = [1, 2, 0], sizes = [1, 1, 128], strides = [1, 1, 1]} : vector<3x3x128xf32> to vector<1x1x128xf32>
    %45 = vector.shape_cast %44 : vector<1x1x128xf32> to vector<128xf32>
    %46 = vector.shape_cast %45 : vector<128xf32> to vector<1x1x128xf32>
    %47 = vector.broadcast %46 : vector<1x1x128xf32> to vector<8x16x128xf32>
    %48 = arith.mulf %43, %47 : vector<8x16x128xf32>
    %49 = arith.addf %42, %48 : vector<8x16x128xf32>
    %50 = vector.extract_strided_slice %6 {offsets = [2, 0, 0], sizes = [8, 16, 128], strides = [1, 1, 1]} : vector<10x16x128xf32> to vector<8x16x128xf32>
    %51 = vector.extract_strided_slice %5 {offsets = [2, 0, 0], sizes = [1, 1, 128], strides = [1, 1, 1]} : vector<3x3x128xf32> to vector<1x1x128xf32>
    %52 = vector.shape_cast %51 : vector<1x1x128xf32> to vector<128xf32>
    %53 = vector.shape_cast %52 : vector<128xf32> to vector<1x1x128xf32>
    %54 = vector.broadcast %53 : vector<1x1x128xf32> to vector<8x16x128xf32>
    %55 = arith.mulf %50, %54 : vector<8x16x128xf32>
    %56 = arith.addf %49, %55 : vector<8x16x128xf32>
    %57 = vector.extract_strided_slice %7 {offsets = [2, 0, 0], sizes = [8, 16, 128], strides = [1, 1, 1]} : vector<10x16x128xf32> to vector<8x16x128xf32>
    %58 = vector.extract_strided_slice %5 {offsets = [2, 1, 0], sizes = [1, 1, 128], strides = [1, 1, 1]} : vector<3x3x128xf32> to vector<1x1x128xf32>
    %59 = vector.shape_cast %58 : vector<1x1x128xf32> to vector<128xf32>
    %60 = vector.shape_cast %59 : vector<128xf32> to vector<1x1x128xf32>
    %61 = vector.broadcast %60 : vector<1x1x128xf32> to vector<8x16x128xf32>
    %62 = arith.mulf %57, %61 : vector<8x16x128xf32>
    %63 = arith.addf %56, %62 : vector<8x16x128xf32>
    %64 = vector.extract_strided_slice %8 {offsets = [2, 0, 0], sizes = [8, 16, 128], strides = [1, 1, 1]} : vector<10x16x128xf32> to vector<8x16x128xf32>
    %65 = vector.extract_strided_slice %5 {offsets = [2, 2, 0], sizes = [1, 1, 128], strides = [1, 1, 1]} : vector<3x3x128xf32> to vector<1x1x128xf32>
    %66 = vector.shape_cast %65 : vector<1x1x128xf32> to vector<128xf32>
    %67 = vector.shape_cast %66 : vector<128xf32> to vector<1x1x128xf32>
    %68 = vector.broadcast %67 : vector<1x1x128xf32> to vector<8x16x128xf32>
    %69 = arith.mulf %64, %68 : vector<8x16x128xf32>
    %70 = arith.addf %63, %69 : vector<8x16x128xf32>
    %c0_5 = arith.constant 0 : index
    %c0_6 = arith.constant 0 : index
    %71 = vector.load %arg5[%c0_5, %c0_6] : memref<1x128xf32, #tpu.memory_space<vmem>>, vector<1x128xf32>
    %72 = vector.shape_cast %71 : vector<1x128xf32> to vector<128xf32>
    %73 = vector.shape_cast %72 : vector<128xf32> to vector<1x1x128xf32>
    %74 = vector.broadcast %73 : vector<1x1x128xf32> to vector<8x16x128xf32>
    %75 = arith.addf %70, %74 : vector<8x16x128xf32>
    %cst = arith.constant 0.000000e+00 : f32
    %cst_7 = arith.constant 6.000000e+00 : f32
    %76 = vector.broadcast %cst : f32 to vector<8x16x128xf32>
    %77 = arith.maximumf %76, %75 : vector<8x16x128xf32>
    %78 = vector.broadcast %cst_7 : f32 to vector<8x16x128xf32>
    %79 = arith.minimumf %78, %77 : vector<8x16x128xf32>
    %80 = vector.shape_cast %79 : vector<8x16x128xf32> to vector<128x128xf32>
    %c0_8 = arith.constant 0 : index
    %c0_9 = arith.constant 0 : index
    %81 = vector.load %arg4[%c0_8, %c0_9] : memref<128x128xf32, #tpu.memory_space<vmem>>, vector<128x128xf32>
    %cst_10 = arith.constant dense<0.000000e+00> : vector<128x128xf32>
    %82 = tpu.matmul %80, %81, %cst_10 {dimension_numbers = #tpu.dot_dimension_numbers<[1], [0], [0], [1], [0, 0, 1, 1], [], []>} : vector<128x128xf32>, vector<128x128xf32>, vector<128x128xf32> -> vector<128x128xf32>
    %c0_11 = arith.constant 0 : index
    %c0_12 = arith.constant 0 : index
    %83 = vector.load %arg6[%c0_11, %c0_12] : memref<1x128xf32, #tpu.memory_space<vmem>>, vector<1x128xf32>
    %84 = vector.shape_cast %83 : vector<1x128xf32> to vector<128xf32>
    %85 = vector.shape_cast %84 : vector<128xf32> to vector<1x128xf32>
    %86 = vector.broadcast %85 : vector<1x128xf32> to vector<128x128xf32>
    %87 = arith.addf %82, %86 : vector<128x128xf32>
    %cst_13 = arith.constant 0.000000e+00 : f32
    %cst_14 = arith.constant 6.000000e+00 : f32
    %88 = vector.broadcast %cst_13 : f32 to vector<128x128xf32>
    %89 = arith.maximumf %88, %87 : vector<128x128xf32>
    %90 = vector.broadcast %cst_14 : f32 to vector<128x128xf32>
    %91 = arith.minimumf %90, %89 : vector<128x128xf32>
    %92 = vector.shape_cast %91 : vector<128x128xf32> to vector<8x16x128xf32>
    %c0_15 = arith.constant 0 : index
    %c0_16 = arith.constant 0 : index
    %c0_17 = arith.constant 0 : index
    %c0_18 = arith.constant 0 : index
    %93 = vector.load %arg7[%c0_15, %c0_16, %c0_17, %c0_18] : memref<1x8x16x128xf32, #tpu.memory_space<vmem>>, vector<1x8x16x128xf32>
    %94 = vector.shape_cast %93 : vector<1x8x16x128xf32> to vector<8x16x128xf32>
    %95 = vector.shape_cast %92 : vector<8x16x128xf32> to vector<1x8x16x128xf32>
    tpu.vector_store %arg7[%c0_15, %c0_16, %c0_17, %c0_18], %95 {strides = array<i32>} : memref<1x8x16x128xf32, #tpu.memory_space<vmem>>, vector<1x8x16x128xf32>,
    return
  }
  func.func @transform_0(%arg0: i32, %arg1: i32) -> (i32, i32, i32, i32) {
    %c0_i32 = arith.constant 0 : i32
    %c0_i32_0 = arith.constant 0 : i32
    %c0_i32_1 = arith.constant 0 : i32
    %c0_i32_2 = arith.constant 0 : i32
    return %arg0, %c0_i32, %c0_i32_0, %c0_i32_1 : i32, i32, i32, i32
  }
  func.func @transform_1(%arg0: i32, %arg1: i32) -> (i32, i32, i32) {
    %c0_i32 = arith.constant 0 : i32
    %c0_i32_0 = arith.constant 0 : i32
    %c0_i32_1 = arith.constant 0 : i32
    %c0_i32_2 = arith.constant 0 : i32
    return %c0_i32, %c0_i32_0, %c0_i32_1 : i32, i32, i32
  }
  func.func @transform_2(%arg0: i32, %arg1: i32) -> (i32, i32) {
    %c0_i32 = arith.constant 0 : i32
    %c0_i32_0 = arith.constant 0 : i32
    %c0_i32_1 = arith.constant 0 : i32
    return %c0_i32, %c0_i32_0 : i32, i32
  }
  func.func @transform_3(%arg0: i32, %arg1: i32) -> (i32, i32) {
    %c0_i32 = arith.constant 0 : i32
    %c0_i32_0 = arith.constant 0 : i32
    %c0_i32_1 = arith.constant 0 : i32
    return %c0_i32, %c0_i32_0 : i32, i32
  }
  func.func @transform_4(%arg0: i32, %arg1: i32) -> (i32, i32) {
    %c0_i32 = arith.constant 0 : i32
    %c0_i32_0 = arith.constant 0 : i32
    %c0_i32_1 = arith.constant 0 : i32
    return %c0_i32, %c0_i32_0 : i32, i32
  }
  func.func @transform_5(%arg0: i32, %arg1: i32) -> (i32, i32, i32, i32) {
    %c0_i32 = arith.constant 0 : i32
    %c0_i32_0 = arith.constant 0 : i32
    %c0_i32_1 = arith.constant 0 : i32
    return %arg0, %arg1, %c0_i32, %c0_i32_0 : i32, i32, i32, i32
  }
}

</mosaic_0001>

<bundles_post_ra>
// kernel: tpu_custom_call.1
= control target key start
LH: loop header
LB: loop body
LE: loop exit
PB: predicated region body
PF: predicated region fallthrough
CT: control target
= control target key end

     0   :  { %10 = vsyncpa [#allocation3], 0  ;;  %s2992_s0 = inlined_call_operand.vmem [shape: f32[2,18,18,128], index: 0, kind: input, shape index: {}]   ;;  %s2993_s1 = inlined_call_operand.vmem [shape: f32[3,3,128], index: 1, kind: input, shape index: {}]   ;;  %s2994_s2 = inlined_call_operand.vmem [shape: f32[128,128], index: 2, kind: input, shape index: {}]   ;;  %s2995_s3 = inlined_call_operand.vmem [shape: f32[1,128], index: 3, kind: input, shape index: {}]   ;;  %s2996_s4 = inlined_call_operand.vmem [shape: f32[1,128], index: 4, kind: input, shape index: {}]   ;;  %s2997_s5 = inlined_call_operand.hbm [shape: f32[2,16,16,128], index: 5, kind: output, shape index: {}]  }
   0x1   :  { %12 = vsyncpa [#allocation3 + $0x1], 0  ;;  %s1821_s18 = smov 0   ;;  %s1823_s19 = smov 0  }
   0x2   :  { %s1825_s20 = smov 0   ;;  %s1827_s21 = smov 0  }
   0x3   :  { %s1829_s22 = smov 0   ;;  %s1831_s23 = smov 0  }
   0x4   :  { %s1833_s24 = smov 0   ;;  %s1835_s25 = smov 0  }
   0x5 LB: > { %s1478_s26 = sadd.s32 4294967295, %s1786_s25   ;;  %s1479_s27 = sadd.s32 4294967294, %s1786_s25   ;;  %s1786_s25 = sphi %s1835_s25, %s18_s25   ;;  %s1782_s24 = sphi %s1833_s24, %s3043_s24   ;;  %s1778_s23 = sphi %s1831_s23, %s3042_s23   ;;  %s1774_s22 = sphi %s1829_s22, %s3041_s22   ;;  %s1770_s21 = sphi %s1827_s21, %s3040_s21   ;;  %s1766_s20 = sphi %s1825_s20, %s3039_s20   ;;  %s1762_s19 = sphi %s1823_s19, %s3038_s19   ;;  %s1758_s18 = sphi %s1821_s18, %s3037_s18  }
   0x6   : > { %s27_s28 = sadd.s32 1, %s1778_s23  ;;  %s30_s29 = sadd.s32 1, %s1782_s24 }
   0x7   : > { %p28_p0 = scmp.ge.s32.totalorder %s27_s28, 2  ;;  %p159_p1 = scmp.ne.s32.totalorder %s1766_s20, %s1762_s19 }
   0x8   : > { %p160_p2 = scmp.eq.s32.totalorder %s1478_s26, 3  ;;  %p165_p5 = scmp.ne.s32.totalorder %s1762_s19, %s1758_s18 }
   0x9   : > { %s3045_s28 = smov (%p28_p0, %s27_s28), 0  ;;  %s3047_s29 = smov (!%p28_p0, %s30_s29), %s1782_s24 }
   0xa   : > { %s145_s30 = ssub.s32 %s1778_s23, %s3045_s28  ;;  %p1872_p3 = por %p160_p2, %p159_p1 }
   0xb   : > { %p32_p4 = scmp.ge.s32.totalorder %s3047_s29, 2  ;;  %p166_p6 = scmp.eq.s32.totalorder %s1479_s27, 3 }
   0xc   : > { %p1482_p7 = scmp.ge.s32.totalorder %s1786_s25, 1  ;;  %p204_p9 = scmp.lt.s32.totalorder %s1786_s25, 5 }
   0xd   : > { %s3049_s29 = smov (%p32_p4, %s3047_s29), 0  ;;  %p1881_p8 = por %p166_p6, %p165_p5 }
   0xe   : > { %3017 = sst [smem:[#allocation5_spill]] %s3049_s29  ;;  %s144_s8 = ssub.s32 %s1782_s24, %s3049_s29 }
   0xf   : > { %s149_s9 = sadd.s32 1, %s1766_s20  ;;  %s146_s10 = sor.u32 %s145_s30, %s144_s8 }
  0x10   : > { %p205_p10 = pnand %p1482_p7, %p204_p9  ;;  %p147_p11 = scmp.eq.s32.totalorder %s146_s10, 0 }
  0x11   : > { %p232_p12 = scmp.lt.s32.totalorder (!%p205_p10), %s1774_s22, 1  ;;  %s1486_s27 = smul.u32 (!%p205_p10), 192, %s1770_s21 }
  0x12   : > { %s1890_s11 = scalar_select %p147_p11, %s1766_s20, %s149_s9  }
  0x13   : > { %208 = sbr.rel (%p205_p10) target bundleno = 419 (0x1a3), region = 40  ;;  %s1496_s15 = sshll.u32 (!%p205_p10), %s1770_s21, 4 }
  0x14   : > { %s1492_s16 = sshll.u32 (!%p205_p10), %s1774_s22, 5 }
  0x15   : > { %s1397_s17 = sadd.s32 (!%p205_p10), %s1496_s15, %s1492_s16 }
  0x18   : > { %v1182_v0 = vld [vmem:[%s2994_s2 + $0x78] sm:$0xff]  ;;  %v1181_v1 = vld [vmem:[%s2994_s2 + $0x70] sm:$0xff]  ;;  %v274_v2 = vlaneseq  ;;  %v1180_v3 = vld [vmem:[%s2994_s2 + $0x68] sm:$0xff]  ;;  %s233_s26 = scalar_select %p232_p12, %s1774_s22, 1  ;;  %vm346_vm0 = vcmask 1046528   ;;  %vm471_vm1 = vcmask 1045504  }
  0x19   : > { %1529 = vmatprep.subr.mxu0 %v1182_v0  ;;  %1585 = vmatprep.subr.mxu1 %v1182_v0  ;;  %v1179_v5 = vld [vmem:[%s2994_s2 + $0x60] sm:$0xff]  ;;  %v1178_v11 = vld [vmem:[%s2994_s2 + $0x58] sm:$0xff]  ;;  %v273_v12 = vld [vmem:[%s2993_s1 + $0x8] sm:$0x7] }
  0x1a   : > { %1530 = vmatpush3.msra.mxu0 %v1182_v0  ;;  %1601 = vmatpush3.msra.mxu1 %v1182_v0  ;;  %v275_v4 = vshrl.u32 %v274_v2, 7  ;;  %s1617_s9 = smul.u32 432, %s233_s26  ;;  %v271_v8 = vld [vmem:[%s2993_s1] sm:$0x7]  ;;  %v272_v9 = vld [vmem:[%s2993_s1 + $0x4] sm:$0x7] }
  0x1b   : > { %1531 = vmatprep.subr.mxu0 %v1181_v1  ;;  %1586 = vmatprep.subr.mxu1 %v1181_v1  ;;  %v1177_v19 = vld [vmem:[%s2994_s2 + $0x50] sm:$0xff]  ;;  %v1176_v29 = vld [vmem:[%s2994_s2 + $0x48] sm:$0xff]  ;;  %v1175_v38 = vld [vmem:[%s2994_s2 + $0x40] sm:$0xff]  ;;  %s1493_s26 = sshll.u32 %s1397_s17, 7 }
  0x1c   : > { %1532 = vmatpush3.msra.mxu0 %v1181_v1  ;;  %1602 = vmatpush3.msra.mxu1 %v1181_v1  ;;  %v276_v6 = vsub.s32 0, %v275_v4  ;;  %v296_v7 = vsub.s32 1, %v275_v4  ;;  %v421_v10 = vsub.s32 2, %v275_v4  ;;  %s236_s30 = scalar_lea.vmem %s2992_s0, %s1617_s9  ;;  %v1174_v48 = vld [vmem:[%s2994_s2 + $0x38] sm:$0xff]  ;;  %v1173_v59 = vld [vmem:[%s2994_s2 + $0x30] sm:$0xff]  ;;  %s2933_s8 = scalar_lea.hbm %s2997_s5, %s1493_s26 }
  0x1d   : > { %1533 = vmatprep.subr.mxu0 %v1180_v3  ;;  %1587 = vmatprep.subr.mxu1 %v1180_v3  ;;  %s1928_s10 = scalar_lea.vmem %s236_s30, %s1486_s27  ;;  %s1788_s27 = smov [#allocation2]  }
  0x1e   : > { %1534 = vmatpush3.msra.mxu0 %v1180_v3  ;;  %1603 = vmatpush3.msra.mxu1 %v1180_v3  ;;  %v1922_v13 = vrot.slane %v271_v8, %v276_v6  ;;  %v1924_v14 = vrot.slane %v271_v8, %v296_v7  ;;  %v1926_v15 = vrot.slane %v272_v9, %v276_v6  ;;  %v241_v20 = vld [vmem:[%s1928_s10] sm:$0xff]  ;;  %v1941_v21 = vld [vmem:[%s1928_s10 + $0x8] sm:$0xff]  ;;  %v1950_v25 = vld [vmem:[%s1928_s10 + $0x18] sm:$0xff]  ;;  %s1698_s12 = sshll.u32 %s1788_s27, 4  ;;  %s1699_s12 = int_to_ptr.vmem [resolvable:$false] %s1698_s12 }
  0x1f   : > { %1535 = vmatprep.subr.mxu0 %v1179_v5  ;;  %1588 = vmatprep.subr.mxu1 %v1179_v5  ;;  %v1930_v16 = vrot.slane %v271_v8, %v421_v10  ;;  %v1932_v17 = vrot.slane %v272_v9, %v296_v7  ;;  %v1934_v18 = vrot.slane %v272_v9, %v421_v10  ;;  %v1962_v30 = vld [vmem:[%s1928_s10 + $0x20] sm:$0xff]  ;;  %v1982_v39 = vld [vmem:[%s1928_s10 + $0x30] sm:$0xff]  ;;  %v2003_v49 = vld [vmem:[%s1928_s10 + $0x38] sm:$0xff] }
  0x20   : > { %1536 = vmatpush3.msra.mxu0 %v1179_v5  ;;  %1604 = vmatpush3.msra.mxu1 %v1179_v5  ;;  %v1943_v22 = vrot.slane %v273_v12, %v276_v6  ;;  %v1945_v23 = vrot.slane %v273_v12, %v296_v7  ;;  %v1947_v24 = vrot.slane %v273_v12, %v421_v10  ;;  %v2019_v57 = vld [vmem:[%s1928_s10 + $0x60] sm:$0xff]  ;;  %v2022_v58 = vld [vmem:[%s1928_s10 + $0x68] sm:$0xff]  ;;  %v2053_v10 = vld [vmem:[%s1928_s10 + $0x78] sm:$0xff] }
  0x21   : > { %1537 = vmatprep.subr.mxu0 %v1178_v11  ;;  %1589 = vmatprep.subr.mxu1 %v1178_v11  ;;  %v278_v26 = vmul.f32 %v1922_v13, %v241_v20  ;;  %v298_v27 = vmul.f32 %v1924_v14, %v241_v20  ;;  %v1956_v28 = vmul.f32 %v1924_v14, %v1941_v21  ;;  %v1172_v3 = vld [vmem:[%s2994_s2 + $0x28] sm:$0xff] }
  0x22   : > { %1538 = vmatpush3.msra.mxu0 %v1178_v11  ;;  %1605 = vmatpush3.msra.mxu1 %v1178_v11  ;;  %v423_v31 = vmul.f32 %v1930_v16, %v241_v20  ;;  %v1967_v32 = vmul.f32 %v1930_v16, %v1941_v21  ;;  %v548_v33 = vmul.f32 %v1926_v15, %v1950_v25 }
  0x23   : > { %1539 = vmatprep.subr.mxu0 %v1177_v19  ;;  %1590 = vmatprep.subr.mxu1 %v1177_v19  ;;  %v347_v34 = vrot.slane %v298_v27, 1  ;;  %v348_v35 = vrot.slane %v1956_v28, 1  ;;  %v584_v36 = vmul.f32 %v1932_v17, %v1950_v25  ;;  %v1976_v37 = vmul.f32 %v1932_v17, %v1962_v30 }
  0x24   : > { %1540 = vmatpush3.msra.mxu0 %v1177_v19  ;;  %1606 = vmatpush3.msra.mxu1 %v1177_v19  ;;  %v472_v40 = vrot.slane %v423_v31, 2  ;;  %v473_v41 = vrot.slane %v1967_v32, 2  ;;  %v708_v42 = vmul.f32 %v1934_v18, %v1950_v25  ;;  %v1989_v43 = vmul.f32 %v1934_v18, %v1962_v30  ;;  %v1171_v19 = vld [vmem:[%s2994_s2 + $0x20] sm:$0xff] }
  0x25   : > { %1541 = vmatprep.subr.mxu0 %v1176_v29  ;;  %1591 = vmatprep.subr.mxu1 %v1176_v29  ;;  %v349_v44 = vsel %vm346_vm0, %v347_v34, %v348_v35  ;;  %v632_v45 = vrot.slane %v584_v36, 1  ;;  %v633_v46 = vrot.slane %v1976_v37, 1  ;;  %v1997_v47 = vmul.f32 %v1943_v22, %v1982_v39 }
  0x26   : > { %1542 = vmatpush3.msra.mxu0 %v1176_v29  ;;  %1607 = vmatpush3.msra.mxu1 %v1176_v29  ;;  %v403_v50 = vadd.f32 %v349_v44, %v278_v26  ;;  %v474_v51 = vsel %vm471_vm1, %v472_v40, %v473_v41  ;;  %v756_v52 = vrot.slane %v708_v42, 2  ;;  %v757_v53 = vrot.slane %v1989_v43, 2  ;;  %v1170_v40 = vld [vmem:[%s2994_s2 + $0x18] sm:$0xff] }
  0x27   : > { %1543 = vmatprep.subr.mxu0 %v1175_v38  ;;  %1592 = vmatprep.subr.mxu1 %v1175_v38  ;;  %v634_v54 = vsel %vm346_vm0, %v632_v45, %v633_v46  ;;  %v868_v55 = vmul.f32 %v1945_v23, %v1982_v39  ;;  %v2016_v56 = vmul.f32 %v1945_v23, %v2003_v49 }
  0x28   : > { %1544 = vmatpush3.msra.mxu0 %v1175_v38  ;;  %1608 = vmatpush3.msra.mxu1 %v1175_v38  ;;  %v528_v60 = vadd.f32 %v474_v51, %v403_v50  ;;  %v758_v61 = vsel %vm471_vm1, %v756_v52, %v757_v53  ;;  %v992_v62 = vmul.f32 %v1947_v24, %v1982_v39 }
  0x29   : > { %1545 = vmatprep.subr.mxu0 %v1174_v48  ;;  %1593 = vmatprep.subr.mxu1 %v1174_v48  ;;  %v916_v63 = vrot.slane %v868_v55, 1  ;;  %v917_v0 = vrot.slane %v2016_v56, 1  ;;  %v2035_v1 = vmul.f32 %v1947_v24, %v2003_v49  ;;  %v286_v2 = vmul.f32 %v1922_v13, %v2019_v57  ;;  %v1169_v55 = vld [vmem:[%s2994_s2 + $0x10] sm:$0xff] }
  0x2a   : > { %1546 = vmatpush3.msra.mxu0 %v1174_v48  ;;  %1609 = vmatpush3.msra.mxu1 %v1174_v48  ;;  %v564_v4 = vadd.f32 %v548_v33, %v528_v60  ;;  %v1040_v5 = vrot.slane %v992_v62, 2  ;;  %v310_v6 = vmul.f32 %v1924_v14, %v2019_v57  ;;  %v2046_v7 = vmul.f32 %v1924_v14, %v2022_v58  ;;  %v2071_v33 = vld [vmem:[%s1928_s10 + $0x80] sm:$0xff]  ;;  %v2087_v48 = vld [vmem:[%s1928_s10 + $0x90] sm:$0xff]  ;;  %v2099_v60 = vld [vmem:[%s1928_s10 + $0x98] sm:$0xff] }
  0x2b   : > { %1547 = vmatprep.subr.mxu0 %v1173_v59  ;;  %1594 = vmatprep.subr.mxu1 %v1173_v59  ;;  %v918_v8 = vsel %vm346_vm0, %v916_v63, %v917_v0  ;;  %v1041_v9 = vrot.slane %v2035_v1, 2  ;;  %v435_v11 = vmul.f32 %v1930_v16, %v2019_v57  ;;  %v2059_v12 = vmul.f32 %v1930_v16, %v2022_v58 }
  0x2c   : > { %1548 = vmatpush3.msra.mxu0 %v1173_v59  ;;  %1610 = vmatpush3.msra.mxu1 %v1173_v59  ;;  %v688_v20 = vadd.f32 %v634_v54, %v564_v4  ;;  %v367_v26 = vrot.slane %v310_v6, 1  ;;  %v368_v27 = vrot.slane %v2046_v7, 1  ;;  %v556_v29 = vmul.f32 %v1926_v15, %v2053_v10 }
  0x2d   : > { %1549 = vmatprep.subr.mxu0 %v1172_v3  ;;  %1595 = vmatprep.subr.mxu1 %v1172_v3  ;;  %v1042_v31 = vsel %vm471_vm1, %v1040_v5, %v1041_v9  ;;  %v492_v34 = vrot.slane %v435_v11, 2  ;;  %v493_v36 = vrot.slane %v2059_v12, 2  ;;  %v596_v38 = vmul.f32 %v1932_v17, %v2053_v10  ;;  %v1168_v5 = vld [vmem:[%s2994_s2 + $0x8] sm:$0xff] }
  0x2e   : > { %1550 = vmatpush3.msra.mxu0 %v1172_v3  ;;  %1611 = vmatpush3.msra.mxu1 %v1172_v3  ;;  %v812_v42 = vadd.f32 %v758_v61, %v688_v20  ;;  %v369_v44 = vsel %vm346_vm0, %v367_v26, %v368_v27  ;;  %v2084_v45 = vmul.f32 %v1932_v17, %v2071_v33  ;;  %v243_v26 = vld [vmem:[%s1928_s10 + $0x10] sm:$0x3] }
  0x2f   : > { %1551 = vmatprep.subr.mxu0 %v1171_v19  ;;  %1596 = vmatprep.subr.mxu1 %v1171_v19  ;;  %v411_v50 = vadd.f32 %v369_v44, %v286_v2  ;;  %v494_v51 = vsel %vm471_vm1, %v492_v34, %v493_v36  ;;  %v652_v52 = vrot.slane %v596_v38, 1  ;;  %v720_v54 = vmul.f32 %v1934_v18, %v2053_v10  ;;  %v2127_v34 = vld [vmem:[%s2995_s3] ss:$0 sm:$0xff] }
  0x30   : > { %1552 = vmatpush3.msra.mxu0 %v1171_v19  ;;  %1612 = vmatpush3.msra.mxu1 %v1171_v19  ;;  %v848_v59 = vadd.f32 %v1997_v47, %v812_v42  ;;  %v3002_v61 = vrot.slane %v2084_v45, 1  ;;  %v2104_v62 = vmul.f32 %v1934_v18, %v2071_v33  ;;  %v840_v63 = vmul.f32 %v1943_v22, %v2087_v48  ;;  %v1167_v44 = vld [vmem:[%s2994_s2] sm:$0xff] }
  0x31   : > { %1553 = vmatprep.subr.mxu0 %v1170_v40  ;;  %1597 = vmatprep.subr.mxu1 %v1170_v40  ;;  %v536_v2 = vadd.f32 %v494_v51, %v411_v50  ;;  %v776_v3 = vrot.slane %v720_v54, 2  ;;  %v880_v4 = vmul.f32 %v1945_v23, %v2087_v48  ;;  %v2112_v47 = vmul.f32 %v1945_v23, %v2099_v60 }
  0x32   : > { %1554 = vmatpush3.msra.mxu0 %v1170_v40  ;;  %1613 = vmatpush3.msra.mxu1 %v1170_v40  ;;  %v972_v6 = vadd.f32 %v918_v8, %v848_v59  ;;  %v654_v11 = vsel %vm346_vm0, %v652_v52, %v3002_v61  ;;  %v3001_v19 = vrot.slane %v2104_v62, 2  ;;  %v1004_v20 = vmul.f32 %v1947_v24, %v2087_v48 }
  0x33   : > { %1555 = vmatprep.subr.mxu0 %v1169_v55  ;;  %1598 = vmatprep.subr.mxu1 %v1169_v55  ;;  %v572_v38 = vadd.f32 %v556_v29, %v536_v2  ;;  %v936_v40 = vrot.slane %v880_v4, 1  ;;  %v3000_v8 = vrot.slane %v2112_v47, 1  ;;  %v2132_v42 = vmul.f32 %v1947_v24, %v2099_v60 }
  0x34   : > { %1556 = vmatpush3.msra.mxu0 %v1169_v55  ;;  %1614 = vmatpush3.msra.mxu1 %v1169_v55  ;;  %v1096_v50 = vadd.f32 %v1042_v31, %v972_v6  ;;  %v778_v51 = vsel %vm471_vm1, %v776_v3, %v3001_v19  ;;  %v1060_v29 = vrot.slane %v1004_v20, 2  ;;  %v279_v52 = vmul.f32 %v1922_v13, %v1941_v21  ;;  %v2149_v3 = vld [vmem:[%s1928_s10 + $0x28] sm:$0x3] }
  0x35   : > { %1557 = vmatprep.subr.mxu0 %v1168_v5  ;;  %1599 = vmatprep.subr.mxu1 %v1168_v5  ;;  %v696_v54 = vadd.f32 %v654_v11, %v572_v38  ;;  %v938_v55 = vsel %vm346_vm0, %v936_v40, %v3000_v8  ;;  %v2999_v59 = vrot.slane %v2132_v42, 2  ;;  %v300_v2 = vmul.f32 %v1924_v14, %v243_v26  ;;  %v2160_v40 = vld [vmem:[%s1928_s10 + $0x40] sm:$0x3] }
  0x36   : > { %1558 = vmatpush3.msra.mxu0 %v1168_v5  ;;  %1615 = vmatpush3.msra.mxu1 %v1168_v5  ;;  %v1119_v31 = vadd.f32 %v2127_v34, %v1096_v50  ;;  %v425_v21 = vmul.f32 %v1930_v16, %v243_v26  ;;  %v549_v4 = vmul.f32 %v1926_v15, %v1962_v30 }
  0x37   : > { %1559 = vmatprep.subr.mxu0 %v1167_v44  ;;  %1600 = vmatprep.subr.mxu1 %v1167_v44  ;;  %v820_v6 = vadd.f32 %v778_v51, %v696_v54  ;;  %v1062_v11 = vsel %vm471_vm1, %v1060_v29, %v2999_v59  ;;  %v350_v20 = vrot.slane %v300_v2, 1  ;;  %v586_v5 = vmul.f32 %v1932_v17, %v2149_v3 }
  0x38   : > { %1560 = vmatpush3.msra.mxu0 %v1167_v44  ;;  %1616 = vmatpush3.msra.mxu1 %v1167_v44  ;;  %v1135_v38 = vmax.f32 %v1119_v31, 0.0  ;;  %v475_v26 = vrot.slane %v425_v21, 2  ;;  %v710_v50 = vmul.f32 %v1934_v18, %v2149_v3  ;;  %v833_v51 = vmul.f32 %v1943_v22, %v2003_v49  ;;  %v2172_v44 = vld [vmem:[%s1928_s10 + $0x70] sm:$0x3] }
  0x39   : > { %v856_v54 = vadd.f32 %v840_v63, %v820_v6  ;;  %v351_v29 = vsel %vm346_vm0, %v348_v35, %v350_v20  ;;  %v635_v2 = vrot.slane %v586_v5, 1  ;;  %v870_v59 = vmul.f32 %v1945_v23, %v2160_v40 }
  0x3a   : > { %v1151_v31 = vmin.f32 %v1135_v38, 6.0  ;;  %v404_v21 = vadd.f32 %v351_v29, %v279_v52  ;;  %v476_v8 = vsel %vm471_vm1, %v473_v41, %v475_v26  ;;  %v759_v19 = vrot.slane %v710_v50, 2 }
  0x3b   : > { %v980_v61 = vadd.f32 %v938_v55, %v856_v54  ;;  %v636_v28 = vsel %vm346_vm0, %v633_v46, %v635_v2  ;;  %v919_v35 = vrot.slane %v870_v59, 1  ;;  %v994_v63 = vmul.f32 %v1947_v24, %v2160_v40  ;;  %v2193_v59 = vld [vmem:[%s1928_s10 + $0x88] sm:$0x3]  ;;  %v2213_v54 = vld [vmem:[%s1928_s10 + $0xa0] sm:$0x3] }
  0x3c   : > { %1561 = vmatprep.mubr.f32.mxu0 %v1151_v31  ;;  %v529_v6 = vadd.f32 %v476_v8, %v404_v21  ;;  %v760_v52 = vsel %vm471_vm1, %v757_v53, %v759_v19  ;;  %v287_v32 = vmul.f32 %v1922_v13, %v2022_v58  ;;  %v312_v41 = vmul.f32 %v1924_v14, %v2172_v44 }
  0x3d   : > { %v1104_v55 = vadd.f32 %v1062_v11, %v980_v61  ;;  %v920_v37 = vsel %vm346_vm0, %v917_v0, %v919_v35  ;;  %v1043_v46 = vrot.slane %v994_v63, 2  ;;  %v437_v43 = vmul.f32 %v1930_v16, %v2172_v44 }
  0x3e   : > { %v565_v8 = vadd.f32 %v549_v4, %v529_v6  ;;  %v370_v53 = vrot.slane %v312_v41, 1  ;;  %v557_v19 = vmul.f32 %v1926_v15, %v2071_v33  ;;  %v598_v20 = vmul.f32 %v1932_v17, %v2193_v59 }
  0x3f   : > { %v1127_v61 = vadd.f32 %v2127_v34, %v1104_v55  ;;  %v1044_v56 = vsel %vm471_vm1, %v1041_v9, %v1043_v46  ;;  %v495_v0 = vrot.slane %v437_v43, 2  ;;  %v722_v11 = vmul.f32 %v1934_v18, %v2193_v59 }
  0x40   : > { %v689_v5 = vadd.f32 %v636_v28, %v565_v8  ;;  %v371_v4 = vsel %vm346_vm0, %v368_v27, %v370_v53  ;;  %v655_v38 = vrot.slane %v598_v20, 1  ;;  %v841_v26 = vmul.f32 %v1943_v22, %v2099_v60 }
  0x41   : > { %v1143_v50 = vmax.f32 %v1127_v61, 0.0  ;;  %v412_v29 = vadd.f32 %v371_v4, %v287_v32  ;;  %v496_v1 = vsel %vm471_vm1, %v493_v36, %v495_v0  ;;  %v779_v9 = vrot.slane %v722_v11, 2 }
  0x42   : > { %v813_v2 = vadd.f32 %v760_v52, %v689_v5  ;;  %v3019_v31 = vrot.slane %v2084_v45, 1  ;;  %v882_v27 = vmul.f32 %v1945_v23, %v2213_v54  ;;  %v1006_v21 = vmul.f32 %v1947_v24, %v2213_v54 }
  0x43   : > { %v1159_v28 = vmin.f32 %v1143_v50, 6.0  ;;  %v537_v35 = vadd.f32 %v496_v1, %v412_v29  ;;  %v3020_v63 = vrot.slane %v2104_v62, 2  ;;  %v280_v36 = vmul.f32 %v1922_v13, %v1950_v25  ;;  %v2268_v1 = vld [vmem:[%s1928_s10 + $0x48] sm:$0xff] }
  0x44   : > { %v656_v7 = vsel %vm346_vm0, %v3019_v31, %v655_v38  ;;  %v849_v6 = vadd.f32 %v833_v51, %v813_v2  ;;  %v939_v52 = vrot.slane %v882_v27, 1  ;;  %v1063_v45 = vrot.slane %v1006_v21, 2 }
  0x45   : > { %v780_v12 = vsel %vm471_vm1, %v3020_v63, %v779_v9  ;;  %v301_v32 = vmul.f32 %v1924_v14, %v1950_v25  ;;  %1573 = vmatprep.mubr.f32.mxu1 %v1159_v28  ;;  %v573_v41 = vadd.f32 %v557_v19, %v537_v35  ;;  %v2234_v55 = vmul.f32 %v1924_v14, %v1962_v30  ;;  %v2278_v63 = vld [vmem:[%s1928_s10 + $0x50] sm:$0xff] }
  0x46   : > { %v426_v62 = vmul.f32 %v1930_v16, %v1950_v25  ;;  %v2240_v46 = vmul.f32 %v1930_v16, %v1962_v30  ;;  %v973_v43 = vadd.f32 %v920_v37, %v849_v6  ;;  %v3021_v51 = vrot.slane %v2112_v47, 1 }
  0x47   : > { %v3022_v53 = vrot.slane %v2132_v42, 2  ;;  %v352_v20 = vrot.slane %v301_v32, 1  ;;  %v697_v61 = vadd.f32 %v656_v7, %v573_v41  ;;  %v353_v0 = vrot.slane %v2234_v55, 1 }
  0x48   : > { %v940_v8 = vsel %vm346_vm0, %v3021_v51, %v939_v52  ;;  %v477_v11 = vrot.slane %v426_v62, 2  ;;  %v478_v25 = vrot.slane %v2240_v46, 2  ;;  %v1097_v5 = vadd.f32 %v1044_v56, %v973_v43 }
  0x49   : > { %v1064_v19 = vsel %vm471_vm1, %v3022_v53, %v1063_v45  ;;  %v550_v37 = vmul.f32 %v1926_v15, %v1982_v39  ;;  %v587_v47 = vmul.f32 %v1932_v17, %v1982_v39  ;;  %v2256_v42 = vmul.f32 %v1932_v17, %v2003_v49 }
  0x4a   : > { %v821_v4 = vadd.f32 %v780_v12, %v697_v61  ;;  %v354_v38 = vsel %vm346_vm0, %v352_v20, %v353_v0  ;;  %v479_v56 = vsel %vm471_vm1, %v477_v11, %v478_v25  ;;  %v711_v50 = vmul.f32 %v1934_v18, %v1982_v39 }
  0x4b   : > { %v1120_v29 = vadd.f32 %v2127_v34, %v1097_v5  ;;  %v405_v9 = vadd.f32 %v354_v38, %v280_v36  ;;  %v637_v2 = vrot.slane %v587_v47, 1  ;;  %v638_v31 = vrot.slane %v2256_v42, 1 }
  0x4c   : > { %v857_v7 = vadd.f32 %v841_v26, %v821_v4  ;;  %v2273_v27 = vmul.f32 %v1934_v18, %v2003_v49  ;;  %v761_v21 = vrot.slane %v711_v50, 2  ;;  %v834_v28 = vmul.f32 %v1943_v22, %v2268_v1 }
  0x4d   : > { %v1136_v35 = vmax.f32 %v1120_v29, 0.0  ;;  %v530_v12 = vadd.f32 %v479_v56, %v405_v9  ;;  %v639_v36 = vsel %vm346_vm0, %v637_v2, %v638_v31  ;;  %v871_v6 = vmul.f32 %v1945_v23, %v2268_v1 }
  0x4e   : > { %v981_v26 = vadd.f32 %v940_v8, %v857_v7  ;;  %v762_v52 = vrot.slane %v2273_v27, 2  ;;  %v2288_v45 = vmul.f32 %v1945_v23, %v2278_v63  ;;  %v995_v32 = vmul.f32 %v1947_v24, %v2268_v1 }
  0x4f   : > { %v1152_v41 = vmin.f32 %v1136_v35, 6.0  ;;  %v566_v62 = vadd.f32 %v550_v37, %v530_v12  ;;  %v921_v43 = vrot.slane %v871_v6, 1  ;;  %v2294_v51 = vmul.f32 %v1947_v24, %v2278_v63 }
  0x50   : > { %v1105_v53 = vadd.f32 %v1064_v19, %v981_v26  ;;  %v763_v8 = vsel %vm471_vm1, %v761_v21, %v762_v52  ;;  %v922_v20 = vrot.slane %v2288_v45, 1  ;;  %v1045_v61 = vrot.slane %v995_v32, 2 }
  0x51   : > { %1562 = vmatmul.mubr.f32.vlgmr.msra.gmra.mxu0 %v1152_v41  ;;  %v690_v11 = vadd.f32 %v639_v36, %v566_v62  ;;  %v3007_v5 = vrot.slane %v2294_v51, 2  ;;  %v288_v37 = vmul.f32 %v1922_v13, %v2053_v10  ;;  %v313_v47 = vmul.f32 %v1924_v14, %v2053_v10 }
  0x52   : > { %v1128_v4 = vadd.f32 %v2127_v34, %v1105_v53  ;;  %v923_v19 = vsel %vm346_vm0, %v921_v43, %v922_v20  ;;  %v2311_v38 = vmul.f32 %v1924_v14, %v2071_v33  ;;  %v438_v56 = vmul.f32 %v1930_v16, %v2053_v10 }
  0x53   : > { %v814_v50 = vadd.f32 %v763_v8, %v690_v11  ;;  %v1047_v29 = vsel %vm471_vm1, %v1045_v61, %v3007_v5  ;;  %v372_v9 = vrot.slane %v313_v47, 1  ;;  %v2320_v2 = vmul.f32 %v1930_v16, %v2071_v33  ;;  %v2342_v8 = vld [vmem:[%s1928_s10 + $0xa8] sm:$0xff] }
  0x54   : > { %v1144_v7 = vmax.f32 %v1128_v4, 0.0  ;;  %v3006_v21 = vrot.slane %v2311_v38, 1  ;;  %v497_v35 = vrot.slane %v438_v56, 2  ;;  %v558_v12 = vmul.f32 %v1926_v15, %v2087_v48  ;;  %v2348_v4 = vld [vmem:[%s1928_s10 + $0xb0] sm:$0xff] }
  0x55   : > { %v850_v36 = vadd.f32 %v834_v28, %v814_v50  ;;  %v3003_v6 = vrot.slane %v2320_v2, 2  ;;  %v599_v26 = vmul.f32 %v1932_v17, %v2087_v48  ;;  %v2330_v32 = vmul.f32 %v1932_v17, %v2099_v60 }
  0x56   : > { %v1160_v41 = vmin.f32 %v1144_v7, 6.0  ;;  %v374_v62 = vsel %vm346_vm0, %v372_v9, %v3006_v21  ;;  %v723_v43 = vmul.f32 %v1934_v18, %v2087_v48  ;;  %v2339_v28 = vmul.f32 %v1934_v18, %v2099_v60 }
  0x57   : > { %v974_v53 = vadd.f32 %v923_v19, %v850_v36  ;;  %v413_v61 = vadd.f32 %v374_v62, %v288_v37  ;;  %v499_v11 = vsel %vm471_vm1, %v497_v35, %v3003_v6  ;;  %v657_v47 = vrot.slane %v599_v26, 1 }
  0x58   : > { %1574 = vmatmul.mubr.f32.vlgmr.msra.gmra.mxu1 %v1160_v41  ;;  %v3005_v56 = vrot.slane %v2330_v32, 1  ;;  %v781_v50 = vrot.slane %v723_v43, 2  ;;  %v3004_v9 = vrot.slane %v2339_v28, 2  ;;  %v842_v7 = vmul.f32 %v1943_v22, %v2342_v8 }
  0x59   : > { %v1098_v19 = vadd.f32 %v1047_v29, %v974_v53  ;;  %v538_v36 = vadd.f32 %v499_v11, %v413_v61  ;;  %v883_v37 = vmul.f32 %v1945_v23, %v2342_v8  ;;  %v2358_v35 = vmul.f32 %v1945_v23, %v2348_v4 }
  0x5a   : > { %v659_v26 = vsel %vm346_vm0, %v657_v47, %v3005_v56  ;;  %v783_v41 = vsel %vm471_vm1, %v781_v50, %v3004_v9  ;;  %v1007_v62 = vmul.f32 %v1947_v24, %v2342_v8  ;;  %v2370_v29 = vmul.f32 %v1947_v24, %v2348_v4 }
  0x5b   : > { %v1121_v43 = vadd.f32 %v2127_v34, %v1098_v19  ;;  %v574_v53 = vadd.f32 %v558_v12, %v538_v36  ;;  %v941_v61 = vrot.slane %v883_v37, 1  ;;  %v3009_v11 = vrot.slane %v2358_v35, 1 }
  0x5c   : > { %v1065_v6 = vrot.slane %v1007_v62, 2  ;;  %v3008_v47 = vrot.slane %v2370_v29, 2  ;;  %v281_v50 = vmul.f32 %v1922_v13, %v1962_v30  ;;  %v303_v9 = vmul.f32 %v1924_v14, %v2149_v3 }
  0x5d   : > { %v1137_v56 = vmax.f32 %v1121_v43, 0.0  ;;  %v698_v21 = vadd.f32 %v659_v26, %v574_v53  ;;  %v943_v19 = vsel %vm346_vm0, %v941_v61, %v3009_v11  ;;  %v428_v12 = vmul.f32 %v1930_v16, %v2149_v3  ;;  %v2392_v53 = vld [vmem:[%s1928_s10 + $0x58] sm:$0x3] }
  0x5e   : > { %v1067_v36 = vsel %vm471_vm1, %v1065_v6, %v3008_v47  ;;  %v355_v37 = vrot.slane %v303_v9, 1  ;;  %v551_v30 = vmul.f32 %v1926_v15, %v2003_v49  ;;  %v589_v62 = vmul.f32 %v1932_v17, %v2160_v40 }
  0x5f   : > { %v1153_v43 = vmin.f32 %v1137_v56, 6.0  ;;  %v822_v26 = vadd.f32 %v783_v41, %v698_v21  ;;  %v480_v5 = vrot.slane %v428_v12, 2  ;;  %v713_v61 = vmul.f32 %v1934_v18, %v2160_v40 }
  0x60   : > { %v356_v3 = vsel %vm346_vm0, %v353_v0, %v355_v37  ;;  %v640_v6 = vrot.slane %v589_v62, 1  ;;  %v835_v9 = vmul.f32 %v1943_v22, %v2278_v63  ;;  %v873_v47 = vmul.f32 %v1945_v23, %v2392_v53 }
  0x61   : > { %1564 = vmatprep.mubr.f32.mxu0 %v1153_v43  ;;  %v858_v56 = vadd.f32 %v842_v7, %v822_v26  ;;  %v406_v21 = vadd.f32 %v356_v3, %v281_v50  ;;  %v481_v41 = vsel %vm471_vm1, %v478_v25, %v480_v5  ;;  %v764_v12 = vrot.slane %v713_v61, 2 }
  0x62   : > { %v641_v55 = vsel %vm346_vm0, %v638_v31, %v640_v6  ;;  %v924_v0 = vrot.slane %v873_v47, 1  ;;  %v997_v37 = vmul.f32 %v1947_v24, %v2392_v53  ;;  %v289_v62 = vmul.f32 %v1922_v13, %v2071_v33 }
  0x63   : > { %v982_v11 = vadd.f32 %v943_v19, %v858_v56  ;;  %v531_v43 = vadd.f32 %v481_v41, %v406_v21  ;;  %v765_v46 = vsel %vm471_vm1, %v762_v52, %v764_v12  ;;  %v315_v25 = vmul.f32 %v1924_v14, %v2193_v59 }
  0x64   : > { %v925_v42 = vsel %vm346_vm0, %v922_v20, %v924_v0  ;;  %v1048_v31 = vrot.slane %v997_v37, 2  ;;  %v440_v5 = vmul.f32 %v1930_v16, %v2193_v59  ;;  %v559_v7 = vmul.f32 %v1926_v15, %v2099_v60 }
  0x65   : > { %v1106_v47 = vadd.f32 %v1067_v36, %v982_v11  ;;  %v567_v50 = vadd.f32 %v551_v30, %v531_v43  ;;  %v375_v27 = vrot.slane %v315_v25, 1  ;;  %v601_v52 = vmul.f32 %v1932_v17, %v2213_v54  ;;  %v2436_v11 = vld [vmem:[%s1928_s10 + $0xb8] sm:$0x3] }
  0x66   : > { %v3023_v19 = vrot.slane %v2294_v51, 2  ;;  %v500_v45 = vrot.slane %v440_v5, 2  ;;  %v725_v20 = vmul.f32 %v1934_v18, %v2213_v54  ;;  %v843_v61 = vmul.f32 %v1943_v22, %v2348_v4 }
  0x67   : > { %v1129_v3 = vadd.f32 %v2127_v34, %v1106_v47  ;;  %v691_v6 = vadd.f32 %v641_v55, %v567_v50  ;;  %v3024_v36 = vrot.slane %v2311_v38, 1  ;;  %v660_v56 = vrot.slane %v601_v52, 1 }
  0x68   : > { %v1049_v26 = vsel %vm471_vm1, %v3023_v19, %v1048_v31  ;;  %v3025_v21 = vrot.slane %v2320_v2, 2  ;;  %v784_v12 = vrot.slane %v725_v20, 2  ;;  %v885_v0 = vmul.f32 %v1945_v23, %v2436_v11 }
  0x69   : > { %v376_v30 = vsel %vm346_vm0, %v3024_v36, %v375_v27  ;;  %v1145_v37 = vmax.f32 %v1129_v3, 0.0  ;;  %v815_v43 = vadd.f32 %v765_v46, %v691_v6  ;;  %v3026_v55 = vrot.slane %v2330_v32, 1 }
  0x6a   : > { %v414_v51 = vadd.f32 %v376_v30, %v289_v62  ;;  %v501_v41 = vsel %vm471_vm1, %v3025_v21, %v500_v45  ;;  %v1009_v38 = vmul.f32 %v1947_v24, %v2436_v11  ;;  %v3027_v62 = vrot.slane %v2339_v28, 2 }
  0x6b   : > { %v661_v25 = vsel %vm346_vm0, %v3026_v55, %v660_v56  ;;  %v944_v5 = vrot.slane %v885_v0, 1  ;;  %v282_v47 = vmul.f32 %v1922_v13, %v1982_v39  ;;  %v1161_v50 = vmin.f32 %v1145_v37, 6.0 }
  0x6c   : > { %v539_v31 = vadd.f32 %v501_v41, %v414_v51  ;;  %v785_v2 = vsel %vm471_vm1, %v3027_v62, %v784_v12  ;;  %v851_v27 = vadd.f32 %v835_v9, %v815_v43  ;;  %v1068_v52 = vrot.slane %v1009_v38, 2 }
  0x6d   : > { %v304_v32 = vmul.f32 %v1924_v14, %v1982_v39  ;;  %v3028_v19 = vrot.slane %v2358_v35, 1  ;;  %v2463_v28 = vmul.f32 %v1924_v14, %v2003_v49  ;;  %v429_v20 = vmul.f32 %v1930_v16, %v1982_v39  ;;  %1576 = vmatprep.mubr.f32.mxu1 %v1161_v50 }
  0x6e   : > { %v575_v46 = vadd.f32 %v559_v7, %v539_v31  ;;  %v975_v3 = vadd.f32 %v925_v42, %v851_v27  ;;  %v3029_v9 = vrot.slane %v2370_v29, 2  ;;  %v2472_v7 = vmul.f32 %v1930_v16, %v2003_v49 }
  0x6f   : > { %v945_v45 = vsel %vm346_vm0, %v3028_v19, %v944_v5  ;;  %v357_v36 = vrot.slane %v304_v32, 1  ;;  %v358_v30 = vrot.slane %v2463_v28, 1  ;;  %v482_v56 = vrot.slane %v429_v20, 2 }
  0x70   : > { %v1069_v6 = vsel %vm471_vm1, %v3029_v9, %v1068_v52  ;;  %v699_v35 = vadd.f32 %v661_v25, %v575_v46  ;;  %v552_v51 = vmul.f32 %v1926_v15, %v2268_v1  ;;  %v1099_v21 = vadd.f32 %v1049_v26, %v975_v3 }
  0x71   : > { %v483_v39 = vrot.slane %v2472_v7, 2  ;;  %v590_v29 = vmul.f32 %v1932_v17, %v2268_v1  ;;  %v2482_v42 = vmul.f32 %v1932_v17, %v2278_v63  ;;  %v359_v12 = vsel %vm346_vm0, %v357_v36, %v358_v30 }
  0x72   : > { %v823_v41 = vadd.f32 %v785_v2, %v699_v35  ;;  %v714_v0 = vmul.f32 %v1934_v18, %v2268_v1  ;;  %v2491_v26 = vmul.f32 %v1934_v18, %v2278_v63  ;;  %v1122_v37 = vadd.f32 %v2127_v34, %v1099_v21 }
  0x73   : > { %v407_v43 = vadd.f32 %v359_v12, %v282_v47  ;;  %v484_v55 = vsel %vm471_vm1, %v482_v56, %v483_v39  ;;  %v642_v25 = vrot.slane %v590_v29, 1  ;;  %v643_v31 = vrot.slane %v2482_v42, 1 }
  0x74   : > { %v859_v38 = vadd.f32 %v843_v61, %v823_v41  ;;  %v766_v62 = vrot.slane %v714_v0, 2  ;;  %v767_v2 = vrot.slane %v2491_v26, 2  ;;  %v1138_v5 = vmax.f32 %v1122_v37, 0.0 }
  0x75   : > { %v532_v50 = vadd.f32 %v484_v55, %v407_v43  ;;  %v836_v27 = vmul.f32 %v1943_v22, %v2019_v57  ;;  %v874_v52 = vmul.f32 %v1945_v23, %v2019_v57  ;;  %v644_v32 = vsel %vm346_vm0, %v642_v25, %v643_v31 }
  0x76   : > { %v983_v47 = vadd.f32 %v945_v45, %v859_v38  ;;  %v768_v61 = vsel %vm471_vm1, %v766_v62, %v767_v2  ;;  %v2511_v46 = vmul.f32 %v1945_v23, %v2022_v58  ;;  %v1154_v19 = vmin.f32 %v1138_v5, 6.0 }
  0x77   : > { %v568_v20 = vadd.f32 %v552_v51, %v532_v50  ;;  %v926_v3 = vrot.slane %v874_v52, 1  ;;  %v998_v9 = vmul.f32 %v1947_v24, %v2019_v57  ;;  %v2518_v35 = vmul.f32 %v1947_v24, %v2022_v58 }
  0x78   : > { %v1107_v36 = vadd.f32 %v1069_v6, %v983_v47  ;;  %v927_v45 = vrot.slane %v2511_v46, 1  ;;  %v290_v56 = vmul.f32 %v1922_v13, %v2087_v48  ;;  %1565 = vmatmul.mubr.f32.gmra.mxu0 %v1154_v19  ;;  %v316_v51 = vmul.f32 %v1924_v14, %v2087_v48  ;;  %v2649_v46 = vld [vmem:[%s1928_s10 + $0xd0] sm:$0x3] }
  0x79   : > { %v692_v21 = vadd.f32 %v644_v32, %v568_v20  ;;  %v1050_v29 = vrot.slane %v998_v9, 2  ;;  %v2526_v41 = vmul.f32 %v1924_v14, %v2099_v60  ;;  %v3015_v0 = vrot.slane %v2518_v35, 2 }
  0x7a   : > { %v1130_v6 = vadd.f32 %v2127_v34, %v1107_v36  ;;  %v928_v12 = vsel %vm346_vm0, %v926_v3, %v927_v45  ;;  %v441_v37 = vmul.f32 %v1930_v16, %v2087_v48  ;;  %v377_v55 = vrot.slane %v316_v51, 1 }
  0x7b   : > { %v816_v43 = vadd.f32 %v768_v61, %v692_v21  ;;  %v3012_v25 = vrot.slane %v2526_v41, 1  ;;  %v2538_v38 = vmul.f32 %v1930_v16, %v2099_v60  ;;  %v1052_v5 = vsel %vm471_vm1, %v1050_v29, %v3015_v0 }
  0x7c   : > { %v1146_v62 = vmax.f32 %v1130_v6, 0.0  ;;  %v502_v50 = vrot.slane %v441_v37, 2  ;;  %v560_v52 = vmul.f32 %v1926_v15, %v2342_v8  ;;  %v602_v61 = vmul.f32 %v1932_v17, %v2342_v8 }
  0x7d   : > { %v852_v48 = vadd.f32 %v836_v27, %v816_v43  ;;  %v379_v47 = vsel %vm346_vm0, %v377_v55, %v3012_v25  ;;  %v3011_v32 = vrot.slane %v2538_v38, 2  ;;  %v2553_v3 = vmul.f32 %v1932_v17, %v2348_v4  ;;  %v2558_v27 = vld [vmem:[%s1928_s10 + $0xc0] sm:$0xff] }
  0x7e   : > { %v1162_v19 = vmin.f32 %v1146_v62, 6.0  ;;  %v415_v20 = vadd.f32 %v379_v47, %v290_v56  ;;  %v726_v9 = vmul.f32 %v1934_v18, %v2342_v8  ;;  %v662_v29 = vrot.slane %v602_v61, 1  ;;  %v2568_v56 = vld [vmem:[%s1928_s10 + $0xc8] sm:$0xff] }
  0x7f   : > { %v976_v36 = vadd.f32 %v928_v12, %v852_v48  ;;  %v504_v21 = vsel %vm471_vm1, %v502_v50, %v3011_v32  ;;  %v2565_v51 = vmul.f32 %v1934_v18, %v2348_v4  ;;  %v3010_v37 = vrot.slane %v2553_v3, 1 }
  0x80   : > { %1577 = vmatmul.mubr.f32.gmra.mxu1 %v1162_v19  ;;  %v540_v6 = vadd.f32 %v504_v21, %v415_v20  ;;  %v786_v43 = vrot.slane %v726_v9, 2  ;;  %v844_v12 = vmul.f32 %v1943_v22, %v2558_v27  ;;  %v886_v50 = vmul.f32 %v1945_v23, %v2558_v27 }
  0x81   : > { %v1100_v55 = vadd.f32 %v1052_v5, %v976_v36  ;;  %v3014_v62 = vrot.slane %v2565_v51, 2  ;;  %v2578_v48 = vmul.f32 %v1945_v23, %v2568_v56  ;;  %v664_v61 = vsel %vm346_vm0, %v662_v29, %v3010_v37 }
  0x82   : > { %v576_v47 = vadd.f32 %v560_v52, %v540_v6  ;;  %v1010_v19 = vmul.f32 %v1947_v24, %v2558_v27  ;;  %v2587_v5 = vmul.f32 %v1947_v24, %v2568_v56  ;;  %v946_v36 = vrot.slane %v886_v50, 1 }
  0x83   : > { %v1123_v20 = vadd.f32 %v2127_v34, %v1100_v55  ;;  %v788_v9 = vsel %vm471_vm1, %v786_v43, %v3014_v62  ;;  %v3013_v52 = vrot.slane %v2578_v48, 1  ;;  %v283_v37 = vmul.f32 %v1922_v13, %v2003_v49 }
  0x84   : > { %v700_v21 = vadd.f32 %v664_v61, %v576_v47  ;;  %v1070_v6 = vrot.slane %v1010_v19, 2  ;;  %v1071_v29 = vrot.slane %v2587_v5, 2  ;;  %v306_v55 = vmul.f32 %v1924_v14, %v2160_v40 }
  0x85   : > { %v1139_v32 = vmax.f32 %v1123_v20, 0.0  ;;  %v948_v25 = vsel %vm346_vm0, %v946_v36, %v3013_v52  ;;  %v431_v43 = vmul.f32 %v1930_v16, %v2160_v40  ;;  %v553_v61 = vmul.f32 %v1926_v15, %v2278_v63 }
  0x86   : > { %v824_v50 = vadd.f32 %v788_v9, %v700_v21  ;;  %v1072_v47 = vsel %vm471_vm1, %v1070_v6, %v1071_v29  ;;  %v592_v49 = vmul.f32 %v1932_v17, %v2392_v53  ;;  %v360_v20 = vrot.slane %v306_v55, 1 }
  0x87   : > { %v1155_v19 = vmin.f32 %v1139_v32, 6.0  ;;  %v485_v36 = vrot.slane %v431_v43, 2  ;;  %v716_v52 = vmul.f32 %v1934_v18, %v2392_v53  ;;  %v837_v40 = vmul.f32 %v1943_v22, %v2022_v58 }
  0x88   : > { %v860_v62 = vadd.f32 %v844_v12, %v824_v50  ;;  %v645_v0 = vrot.slane %v592_v49, 1  ;;  %v876_v9 = vmul.f32 %v1945_v23, %v2172_v44  ;;  %v361_v21 = vsel %vm346_vm0, %v358_v30, %v360_v20 }
  0x89   : > { %1567 = vmatprep.mubr.f32.mxu0 %v1155_v19  ;;  %v486_v32 = vsel %vm471_vm1, %v483_v39, %v485_v36  ;;  %v769_v6 = vrot.slane %v716_v52, 2  ;;  %v1000_v12 = vmul.f32 %v1947_v24, %v2172_v44  ;;  %v408_v43 = vadd.f32 %v361_v21, %v283_v37 }
  0x8a   : > { %v984_v55 = vadd.f32 %v948_v25, %v860_v62  ;;  %v646_v50 = vsel %vm346_vm0, %v643_v31, %v645_v0  ;;  %v929_v49 = vrot.slane %v876_v9, 1  ;;  %v291_v7 = vmul.f32 %v1922_v13, %v2099_v60 }
  0x8b   : > { %v770_v28 = vsel %vm471_vm1, %v767_v2, %v769_v6  ;;  %v1053_v30 = vrot.slane %v1000_v12, 2  ;;  %v318_v39 = vmul.f32 %v1924_v14, %v2213_v54  ;;  %v533_v25 = vadd.f32 %v486_v32, %v408_v43 }
  0x8c   : > { %v1108_v52 = vadd.f32 %v1072_v47, %v984_v55  ;;  %v930_v42 = vsel %vm346_vm0, %v927_v45, %v929_v49  ;;  %v443_v31 = vmul.f32 %v1930_v16, %v2213_v54  ;;  %v3030_v26 = vrot.slane %v2518_v35, 2 }
  0x8d   : > { %v380_v0 = vrot.slane %v318_v39, 1  ;;  %v561_v60 = vmul.f32 %v1926_v15, %v2348_v4  ;;  %v604_v37 = vmul.f32 %v1932_v17, %v2436_v11  ;;  %v569_v47 = vadd.f32 %v553_v61, %v533_v25 }
  0x8e   : > { %v1054_v2 = vsel %vm471_vm1, %v3030_v26, %v1053_v30  ;;  %v1131_v62 = vadd.f32 %v2127_v34, %v1108_v52  ;;  %v505_v45 = vrot.slane %v443_v31, 2  ;;  %v728_v54 = vmul.f32 %v1934_v18, %v2436_v11 }
  0x8f   : > { %v3031_v35 = vrot.slane %v2526_v41, 1  ;;  %v665_v20 = vrot.slane %v604_v37, 1  ;;  %v845_v36 = vmul.f32 %v1943_v22, %v2568_v56  ;;  %v888_v9 = vmul.f32 %v1945_v23, %v2649_v46 }
  0x90   : > { %v1147_v21 = vmax.f32 %v1131_v62, 0.0  ;;  %v693_v32 = vadd.f32 %v646_v50, %v569_v47  ;;  %v3032_v6 = vrot.slane %v2538_v38, 2  ;;  %v3033_v55 = vrot.slane %v2553_v3, 1 }
  0x91   : > { %v381_v19 = vsel %vm346_vm0, %v3031_v35, %v380_v0  ;;  %v789_v43 = vrot.slane %v728_v54, 2  ;;  %v949_v49 = vrot.slane %v888_v9, 1  ;;  %v1012_v30 = vmul.f32 %v1947_v24, %v2649_v46 }
  0x92   : > { %v416_v61 = vadd.f32 %v381_v19, %v291_v7  ;;  %v506_v12 = vsel %vm471_vm1, %v3032_v6, %v505_v45  ;;  %v666_v41 = vsel %vm346_vm0, %v3033_v55, %v665_v20  ;;  %v1163_v39 = vmin.f32 %v1147_v21, 6.0 }
  0x93   : > { %v817_v52 = vadd.f32 %v770_v28, %v693_v32  ;;  %v284_v50 = vmul.f32 %v1922_v13, %v2268_v1  ;;  %v3034_v7 = vrot.slane %v2565_v51, 2  ;;  %v3035_v31 = vrot.slane %v2578_v48, 1 }
  0x94   : > { %v541_v25 = vadd.f32 %v506_v12, %v416_v61  ;;  %v1073_v26 = vrot.slane %v1012_v30, 2  ;;  %v307_v0 = vmul.f32 %v1924_v14, %v2268_v1  ;;  %1579 = vmatprep.mubr.f32.mxu1 %v1163_v39  ;;  %v2680_v28 = vmul.f32 %v1924_v14, %v2278_v63 }
  0x95   : > { %v790_v38 = vsel %vm471_vm1, %v3034_v7, %v789_v43  ;;  %v950_v3 = vsel %vm346_vm0, %v3035_v31, %v949_v49  ;;  %v853_v37 = vadd.f32 %v837_v40, %v817_v52  ;;  %v432_v51 = vmul.f32 %v1930_v16, %v2268_v1 }
  0x96   : > { %v577_v62 = vadd.f32 %v561_v60, %v541_v25  ;;  %v1074_v48 = vsel %vm471_vm1, %v1071_v29, %v1073_v26  ;;  %v362_v47 = vrot.slane %v307_v0, 1  ;;  %v2689_v45 = vmul.f32 %v1930_v16, %v2278_v63 }
  0x97   : > { %v554_v40 = vmul.f32 %v1926_v15, %v2019_v57  ;;  %v977_v60 = vadd.f32 %v930_v42, %v853_v37  ;;  %v363_v35 = vrot.slane %v2680_v28, 1  ;;  %v487_v19 = vrot.slane %v432_v51, 2 }
  0x98   : > { %v701_v54 = vadd.f32 %v666_v41, %v577_v62  ;;  %v488_v20 = vrot.slane %v2689_v45, 2  ;;  %v593_v1 = vmul.f32 %v1932_v17, %v2019_v57  ;;  %v2699_v5 = vmul.f32 %v1932_v17, %v2022_v58 }
  0x99   : > { %v717_v29 = vmul.f32 %v1934_v18, %v2019_v57  ;;  %v1101_v9 = vadd.f32 %v1054_v2, %v977_v60  ;;  %v364_v42 = vsel %vm346_vm0, %v362_v47, %v363_v35  ;;  %v2708_v32 = vmul.f32 %v1934_v18, %v2022_v58 }
  0x9a   : > { %v825_v21 = vadd.f32 %v790_v38, %v701_v54  ;;  %v409_v61 = vadd.f32 %v364_v42, %v284_v50  ;;  %v489_v6 = vsel %vm471_vm1, %v487_v19, %v488_v20  ;;  %v647_v12 = vrot.slane %v593_v1, 1 }
  0x9b   : > { %v648_v55 = vrot.slane %v2699_v5, 1  ;;  %v1124_v57 = vadd.f32 %v2127_v34, %v1101_v9  ;;  %v771_v41 = vrot.slane %v717_v29, 2  ;;  %v772_v43 = vrot.slane %v2708_v32, 2 }
  0x9c   : > { %v861_v2 = vadd.f32 %v845_v36, %v825_v21  ;;  %v534_v49 = vadd.f32 %v489_v6, %v409_v61  ;;  %v838_v30 = vmul.f32 %v1943_v22, %v2053_v10  ;;  %v877_v39 = vmul.f32 %v1945_v23, %v2053_v10 }
  0x9d   : > { %v649_v58 = vsel %vm346_vm0, %v647_v12, %v648_v55  ;;  %v1140_v52 = vmax.f32 %v1124_v57, 0.0  ;;  %v773_v36 = vsel %vm471_vm1, %v771_v41, %v772_v43  ;;  %v2728_v50 = vmul.f32 %v1945_v23, %v2071_v33 }
  0x9e   : > { %v985_v25 = vadd.f32 %v950_v3, %v861_v2  ;;  %v570_v7 = vadd.f32 %v554_v40, %v534_v49  ;;  %v931_v38 = vrot.slane %v877_v39, 1  ;;  %v1001_v31 = vmul.f32 %v1947_v24, %v2053_v10  ;;  %v268_v49 = vld [vmem:[%s1928_s10 + $0xd8] sm:$0xff] }
  0x9f   : > { %v2734_v26 = vmul.f32 %v1947_v24, %v2071_v33  ;;  %v1156_v0 = vmin.f32 %v1140_v52, 6.0  ;;  %v932_v3 = vrot.slane %v2728_v50, 1  ;;  %v292_v62 = vmul.f32 %v1922_v13, %v2342_v8 }
  0xa0   : > { %v1109_v37 = vadd.f32 %v1074_v48, %v985_v25  ;;  %v694_v51 = vadd.f32 %v649_v58, %v570_v7  ;;  %v1055_v47 = vrot.slane %v1001_v31, 2  ;;  %v319_v40 = vmul.f32 %v1924_v14, %v2342_v8  ;;  %v2771_v58 = vld [vmem:[%s1928_s10 + $0xe0] sm:$0xff] }
  0xa1   : > { %v1056_v60 = vrot.slane %v2734_v26, 2  ;;  %1568 = vmatmul.mubr.f32.gmra.mxu0 %v1156_v0  ;;  %v933_v33 = vsel %vm346_vm0, %v931_v38, %v932_v3  ;;  %v2748_v48 = vmul.f32 %v1924_v14, %v2348_v4  ;;  %v444_v54 = vmul.f32 %v1930_v16, %v2342_v8 }
  0xa2   : > { %v1132_v10 = vadd.f32 %v2127_v34, %v1109_v37  ;;  %v818_v19 = vadd.f32 %v773_v36, %v694_v51  ;;  %v382_v29 = vrot.slane %v319_v40, 1  ;;  %v2757_v9 = vmul.f32 %v1930_v16, %v2348_v4 }
  0xa3   : > { %v1057_v1 = vsel %vm471_vm1, %v1055_v47, %v1056_v60  ;;  %v383_v42 = vrot.slane %v2748_v48, 1  ;;  %v507_v61 = vrot.slane %v444_v54, 2  ;;  %v562_v6 = vmul.f32 %v1926_v15, %v2558_v27 }
  0xa4   : > { %v1148_v21 = vmax.f32 %v1132_v10, 0.0  ;;  %v854_v12 = vadd.f32 %v838_v30, %v818_v19  ;;  %v508_v8 = vrot.slane %v2757_v9, 2  ;;  %v605_v57 = vmul.f32 %v1932_v17, %v2558_v27 }
  0xa5   : > { %v2767_v2 = vmul.f32 %v1932_v17, %v2568_v56  ;;  %v384_v39 = vsel %vm346_vm0, %v382_v29, %v383_v42  ;;  %v729_v30 = vmul.f32 %v1934_v18, %v2558_v27  ;;  %v2780_v52 = vmul.f32 %v1934_v18, %v2568_v56 }
  0xa6   : > { %v1164_v41 = vmin.f32 %v1148_v21, 6.0  ;;  %v978_v25 = vadd.f32 %v933_v33, %v854_v12  ;;  %v417_v36 = vadd.f32 %v384_v39, %v292_v62  ;;  %v509_v7 = vsel %vm471_vm1, %v507_v61, %v508_v8 }
  0xa7   : > { %v667_v38 = vrot.slane %v605_v57, 1  ;;  %v668_v31 = vrot.slane %v2767_v2, 1  ;;  %v791_v0 = vrot.slane %v729_v30, 2  ;;  %v792_v37 = vrot.slane %v2780_v52, 2 }
  0xa8   : > { %1580 = vmatmul.mubr.f32.gmra.mxu1 %v1164_v41  ;;  %v1102_v51 = vadd.f32 %v1057_v1, %v978_v25  ;;  %v542_v47 = vadd.f32 %v509_v7, %v417_v36  ;;  %v889_v27 = vmul.f32 %v1945_v23, %v268_v49  ;;  %v2790_v40 = vmul.f32 %v1945_v23, %v2771_v58 }
  0xa9   : > { %v669_v62 = vsel %vm346_vm0, %v667_v38, %v668_v31  ;;  %v1013_v10 = vmul.f32 %v1947_v24, %v268_v49  ;;  %v2798_v33 = vmul.f32 %v1947_v24, %v2771_v58  ;;  %v846_v1 = vmul.f32 %v1943_v22, %v268_v49 }
  0xaa   : > { %v1125_v54 = vadd.f32 %v2127_v34, %v1102_v51  ;;  %v578_v19 = vadd.f32 %v562_v6, %v542_v47  ;;  %v793_v29 = vsel %vm471_vm1, %v791_v0, %v792_v37  ;;  %v951_v21 = vrot.slane %v889_v27, 1 }
  0xab   : > { %v952_v61 = vrot.slane %v2790_v40, 1  ;;  %v309_v12 = vmul.f32 %v1924_v14, %v2392_v53  ;;  %v285_v39 = vmul.f32 %v1922_v13, %v2278_v63  ;;  %v434_v34 = vmul.f32 %v1930_v16, %v2392_v53  ;;  %v2891_v40 = vld [vmem:[%s2996_s4] ss:$0 sm:$0xff] }
  0xac   : > { %v1141_v57 = vmax.f32 %v1125_v54, 0.0  ;;  %v702_v41 = vadd.f32 %v669_v62, %v578_v19  ;;  %v1075_v6 = vrot.slane %v1013_v10, 2  ;;  %v1076_v49 = vrot.slane %v2798_v33, 2  ;;  %v1691_v10 = vld [vmem:[%s1928_s10 + $0x68] sm:$0xff] }
  0xad   : > { %v365_v30 = vrot.slane %v309_v12, 1  ;;  %v595_v25 = vmul.f32 %v1932_v17, %v2172_v44  ;;  %v490_v38 = vrot.slane %v434_v34, 2  ;;  %v719_v0 = vmul.f32 %v1934_v18, %v2172_v44 }
  0xae   : > { %v1157_v36 = vmin.f32 %v1141_v57, 6.0  ;;  %v826_v7 = vadd.f32 %v793_v29, %v702_v41  ;;  %v953_v63 = vsel %vm346_vm0, %v951_v21, %v952_v61  ;;  %v555_v54 = vmul.f32 %v1691_v10, %v1926_v15 }
  0xaf   : > { %v366_v53 = vsel %vm346_vm0, %v363_v35, %v365_v30  ;;  %v650_v51 = vrot.slane %v595_v25, 1  ;;  %v491_v62 = vsel %vm471_vm1, %v488_v20, %v490_v38  ;;  %v1077_v44 = vsel %vm471_vm1, %v1075_v6, %v1076_v49 }
  0xb0   : > { %1570 = vmatprep.mubr.f32.mxu0 %v1157_v36  ;;  %v862_v47 = vadd.f32 %v846_v1, %v826_v7  ;;  %v410_v27 = vadd.f32 %v366_v53, %v285_v39  ;;  %v774_v19 = vrot.slane %v719_v0, 2  ;;  %v879_v28 = vmul.f32 %v1945_v23, %v2193_v59  ;;  %v1692_v1 = vld [vmem:[%s1928_s10 + $0x80] sm:$0xff] }
  0xb1   : > { %v839_v21 = vmul.f32 %v1692_v1, %v1943_v22  ;;  %v321_v45 = vmul.f32 %v1924_v14, %v2436_v11  ;;  %v651_v20 = vsel %vm346_vm0, %v648_v55, %v650_v51  ;;  %v1003_v12 = vmul.f32 %v1947_v24, %v2193_v59  ;;  %v270_v55 = vld [vmem:[%s1928_s10 + $0xe8] sm:$0x3]  ;;  %s229_s10 = sand.u32 1, %s1762_s19  }
  0xb2   : > { %v986_v35 = vadd.f32 %v953_v63, %v862_v47  ;;  %v535_v29 = vadd.f32 %v491_v62, %v410_v27  ;;  %v293_v57 = vmul.f32 %v1922_v13, %v2348_v4  ;;  %v446_v41 = vmul.f32 %v1930_v16, %v2436_v11  ;;  %v1693_v13 = vld [vmem:[%s2995_s3] ss:$0 sm:$0xff]  ;;  %s1483_s13 = sshll.u32 %s229_s10, 7  ;;  %s2941_s29 = scalar_lea.sflag [#allocation3], %s229_s10 }
  0xb3   : > { %v385_v6 = vrot.slane %v321_v45, 1  ;;  %v607_v30 = vmul.f32 %v1932_v17, %v2649_v46  ;;  %v775_v14 = vsel %vm471_vm1, %v772_v43, %v774_v19  ;;  %v934_v5 = vrot.slane %v879_v28, 1  ;;  %s2897_s14 = scalar_lea.vmem [#allocation2], %s1483_s13  ;;  %s1700_s13 = scalar_lea.vmem %s1699_s12, 4096 }
  0xb4   : > { %v1110_v39 = vadd.f32 %v1077_v44, %v986_v35  ;;  %v571_v34 = vadd.f32 %v555_v54, %v535_v29  ;;  %v510_v25 = vrot.slane %v446_v41, 2  ;;  %v731_v59 = vmul.f32 %v1934_v18, %v2649_v46  ;;  %s1400_s21 = sshll.u32 %s2897_s14, 4  ;;  %s2935_s21 = int_to_ptr.vmem [resolvable:$true] %s1400_s21 }
  0xb5   : > { %v386_v17 = vsel %vm346_vm0, %v383_v42, %v385_v6  ;;  %v670_v11 = vrot.slane %v607_v30, 1  ;;  %v1058_v32 = vrot.slane %v1003_v12, 2  ;;  %v563_v18 = vmul.f32 %v1926_v15, %v2568_v56  ;;  %s1694_s9 = scalar_lea.vmem %s2935_s21, 2048  ;;  %p1701_p2 = scmp.lt.s32.totalorder %s2935_s21, %s1699_s12 }
  0xb6   : > { %v1133_v16 = vadd.f32 %v1693_v13, %v1110_v39  ;;  %v695_v4 = vadd.f32 %v651_v20, %v571_v34  ;;  %v418_v36 = vadd.f32 %v386_v17, %v293_v57  ;;  %v511_v43 = vsel %vm471_vm1, %v508_v8, %v510_v25  ;;  %p1695_p13 = scmp.ne.s32.totalorder %s2935_s21, %s1694_s9  ;;  %p1702_p4 = scmp.lt.s32.totalorder %s1700_s13, %s1694_s9 }
  0xb7   : > { %v794_v38 = vrot.slane %v731_v59, 2  ;;  %v891_v0 = vmul.f32 %v1945_v23, %v270_v55  ;;  %v935_v48 = vsel %vm346_vm0, %v932_v3, %v934_v5  ;;  %v671_v9 = vsel %vm346_vm0, %v668_v31, %v670_v11 }
  0xb8   : > { %v1149_v46 = vmax.f32 %v1133_v16, 0.0  ;;  %v819_v7 = vadd.f32 %v775_v14, %v695_v4  ;;  %v543_v42 = vadd.f32 %v511_v43, %v418_v36  ;;  %v1015_v8 = vmul.f32 %v1947_v24, %v270_v55  ;;  %p1696_p0 = pnand %p1695_p13, %p1872_p3  ;;  %p1703_p5 = por %p1702_p4, %p1701_p2 }
  0xb9   : > { %v1059_v15 = vsel %vm471_vm1, %v1056_v60, %v1058_v32  ;;  %v795_v50 = vsel %vm471_vm1, %v792_v37, %v794_v38  ;;  %v954_v3 = vrot.slane %v891_v0, 1  ;;  %v847_v2 = vmul.f32 %v1943_v22, %v2771_v58 }
  0xba   : > { %v1165_v63 = vmin.f32 %v1149_v46, 6.0  ;;  %v855_v53 = vadd.f32 %v839_v21, %v819_v7  ;;  %v579_v56 = vadd.f32 %v563_v18, %v543_v42  ;;  %v1078_v31 = vrot.slane %v1015_v8, 2  ;;  %p1697_p1 = pneg %p1696_p0 }
  0xbb   : > { %v955_v26 = vsel %vm346_vm0, %v952_v61, %v954_v3 }
  0xbc   : > { %1582 = vmatprep.mubr.f32.mxu1 %v1165_v63  ;;  %v979_v23 = vadd.f32 %v935_v48, %v855_v53  ;;  %v703_v51 = vadd.f32 %v671_v9, %v579_v56  ;;  %v1079_v52 = vsel %vm471_vm1, %v1076_v49, %v1078_v31  ;;  %p1704_p6 = pnand %p1703_p5, %p1697_p1 }
  0xbe   : > { %v1103_v47 = vadd.f32 %v1059_v15, %v979_v23  ;;  %v827_v24 = vadd.f32 %v795_v50, %v703_v51 }
  0xc0   : > { %v1126_v27 = vadd.f32 %v1693_v13, %v1103_v47  ;;  %v863_v60 = vadd.f32 %v847_v2, %v827_v24 }
  0xc2   : > { %v1142_v62 = vmax.f32 %v1126_v27, 0.0  ;;  %v987_v37 = vadd.f32 %v955_v26, %v863_v60 }
  0xc4   : > { %v1158_v10 = vmin.f32 %v1142_v62, 6.0  ;;  %v1111_v54 = vadd.f32 %v1079_v52, %v987_v37 }
  0xc6   : > { %1571 = vmatmul.mubr.f32.gmra.mxu0 %v1158_v10  ;;  %v1134_v22 = vadd.f32 %v1693_v13, %v1111_v54 }
  0xc8   : > { %v1150_v58 = vmax.f32 %v1134_v22, 0.0 }
  0xca   : > { %v1166_v44 = vmin.f32 %v1150_v58, 6.0 }
  0xcc   : > { %1583 = vmatmul.mubr.f32.gmra.mxu1 %v1166_v44 }
 0x111   : > { %v1563_v61 = vpop.f32.mrf.mxu0 }
 0x112   : > { %v1262_v33 = vadd.f32 %v1563_v61, %v2891_v40 }
 0x113   : > { %v1256_v49 = vpop.f32.mrf.mxu0 }
 0x114   : > { %v1336_v19 = vmax.f32 %v1262_v33, 0.0  ;;  %v1257_v28 = vadd.f32 %v2891_v40, %v1256_v49 }
 0x116   : > { %v1352_v35 = vmin.f32 %v1336_v19, 6.0  ;;  %v1335_v29 = vmax.f32 %v1257_v28, 0.0 }
 0x118   : > { %1368 = vst [vmem:[%s2897_s14 + $0x8] sm:$0xff] %v1352_v35  ;;  %v1575_v1 = vpop.f32.mrf.mxu1  ;;  %v1351_v21 = vmin.f32 %v1335_v29, 6.0 }
 0x119   : > { %v1302_v45 = vadd.f32 %v1575_v1, %v2891_v40 }
 0x11a   : > { %1367 = vst [vmem:[%s2897_s14] sm:$0xff] %v1351_v21  ;;  %v1296_v20 = vpop.f32.mrf.mxu1 }
 0x11b   : > { %v1344_v12 = vmax.f32 %v1302_v45, 0.0  ;;  %v1297_v57 = vadd.f32 %v2891_v40, %v1296_v20 }
 0x11d   : > { %v1360_v41 = vmin.f32 %v1344_v12, 6.0  ;;  %v1343_v39 = vmax.f32 %v1297_v57, 0.0 }
 0x11f   : > { %1376 = vst [vmem:[%s2897_s14 + $0x48] sm:$0xff] %v1360_v41  ;;  %v1359_v34 = vmin.f32 %v1343_v39, 6.0 }
 0x121   : > { %1375 = vst [vmem:[%s2897_s14 + $0x40] sm:$0xff] %v1359_v34 }
 0x138   : > { %v1566_v6 = vpop.f32.mrf.mxu0 }
 0x139   : > { %v1272_v30 = vadd.f32 %v1566_v6, %v2891_v40 }
 0x13a   : > { %v1266_v14 = vpop.f32.mrf.mxu0 }
 0x13b   : > { %v1338_v5 = vmax.f32 %v1272_v30, 0.0  ;;  %v1267_v55 = vadd.f32 %v2891_v40, %v1266_v14 }
 0x13d   : > { %v1354_v25 = vmin.f32 %v1338_v5, 6.0  ;;  %v1337_v59 = vmax.f32 %v1267_v55, 0.0 }
 0x13f   : > { %1370 = vst [vmem:[%s2897_s14 + $0x18] sm:$0xff] %v1354_v25  ;;  %v1353_v16 = vmin.f32 %v1337_v59, 6.0 }
 0x140   : > { %v1578_v13 = vpop.f32.mrf.mxu1 }
 0x141   : > { %v1312_v4 = vadd.f32 %v1578_v13, %v2891_v40  ;;  %1369 = vst [vmem:[%s2897_s14 + $0x10] sm:$0xff] %v1353_v16 }
 0x142   : > { %v1306_v17 = vpop.f32.mrf.mxu1 }
 0x143   : > { %v1346_v11 = vmax.f32 %v1312_v4, 0.0  ;;  %v1307_v32 = vadd.f32 %v2891_v40, %v1306_v17 }
 0x145   : > { %v1362_v36 = vmin.f32 %v1346_v11, 6.0  ;;  %v1345_v43 = vmax.f32 %v1307_v32, 0.0 }
 0x147   : > { %1378 = vst [vmem:[%s2897_s14 + $0x58] sm:$0xff] %v1362_v36  ;;  %v1361_v18 = vmin.f32 %v1345_v43, 6.0 }
 0x149   : > { %1377 = vst [vmem:[%s2897_s14 + $0x50] sm:$0xff] %v1361_v18 }
 0x161   : > { %v1569_v46 = vpop.f32.mrf.mxu0 }
 0x162   : > { %v1282_v7 = vadd.f32 %v1569_v46, %v2891_v40 }
 0x163   : > { %v1276_v38 = vpop.f32.mrf.mxu0 }
 0x164   : > { %v1340_v0 = vmax.f32 %v1282_v7, 0.0  ;;  %v1277_v48 = vadd.f32 %v2891_v40, %v1276_v38 }
 0x166   : > { %v1356_v42 = vmin.f32 %v1340_v0, 6.0  ;;  %v1339_v63 = vmax.f32 %v1277_v48, 0.0 }
 0x168   : > { %v1581_v53 = vpop.f32.mrf.mxu1  ;;  %1372 = vst [vmem:[%s2897_s14 + $0x28] sm:$0xff] %v1356_v42  ;;  %v1355_v8 = vmin.f32 %v1339_v63, 6.0 }
 0x169   : > { %v1322_v9 = vadd.f32 %v1581_v53, %v2891_v40 }
 0x16a   : > { %v1316_v15 = vpop.f32.mrf.mxu1  ;;  %1371 = vst [vmem:[%s2897_s14 + $0x20] sm:$0xff] %v1355_v8 }
 0x16b   : > { %v1348_v56 = vmax.f32 %v1322_v9, 0.0  ;;  %v1317_v23 = vadd.f32 %v2891_v40, %v1316_v15 }
 0x16d   : > { %v1364_v50 = vmin.f32 %v1348_v56, 6.0  ;;  %v1347_v3 = vmax.f32 %v1317_v23, 0.0 }
 0x16f   : > { %1380 = vst [vmem:[%s2897_s14 + $0x68] sm:$0xff] %v1364_v50  ;;  %v1363_v51 = vmin.f32 %v1347_v3, 6.0 }
 0x171   : > { %1379 = vst [vmem:[%s2897_s14 + $0x60] sm:$0xff] %v1363_v51 }
 0x186   : > { %v1572_v2 = vpop.f32.mrf.mxu0 }
 0x187   : > { %v1292_v47 = vadd.f32 %v1572_v2, %v2891_v40 }
 0x188   : > { %v1286_v31 = vpop.f32.mrf.mxu0 }
 0x189   : > { %v1342_v24 = vmax.f32 %v1292_v47, 0.0  ;;  %v1287_v27 = vadd.f32 %v2891_v40, %v1286_v31 }
 0x18b   : > { %v1358_v26 = vmin.f32 %v1342_v24, 6.0  ;;  %v1341_v60 = vmax.f32 %v1287_v27, 0.0 }
 0x18c   : > { %v1584_v62 = vpop.f32.mrf.mxu1 }
 0x18d   : > { %1374 = vst [vmem:[%s2897_s14 + $0x38] sm:$0xff] %v1358_v26  ;;  %v1357_v52 = vmin.f32 %v1341_v60, 6.0  ;;  %v1332_v37 = vadd.f32 %v1584_v62, %v2891_v40 }
 0x18e   : > { %v1326_v10 = vpop.f32.mrf.mxu1 }
 0x18f   : > { %1373 = vst [vmem:[%s2897_s14 + $0x30] sm:$0xff] %v1357_v52  ;;  %v1350_v54 = vmax.f32 %v1332_v37, 0.0  ;;  %v1327_v22 = vadd.f32 %v2891_v40, %v1326_v10 }
 0x191   : > { %v1366_v58 = vmin.f32 %v1350_v54, 6.0  ;;  %v1349_v44 = vmax.f32 %v1327_v22, 0.0 }
 0x193   : > { %1382 = vst [vmem:[%s2897_s14 + $0x78] sm:$0xff] %v1366_v58  ;;  %v1365_v61 = vmin.f32 %v1349_v44, 6.0 }
 0x195   : > { %1381 = vst [vmem:[%s2897_s14 + $0x70] sm:$0xff] %v1365_v61 }
 0x196   : > { %1707 = shalt.err (!%p1704_p6)
}
 0x197   : > { %s1708_s10 = scalar_lea.hbm %s2933_s8, 2048  ;;  %s1712_s16 = scalar_lea.hbm %s2997_s5, 8192 }
 0x198   : > { %p1709_p7 = scmp.ne.s32.totalorder %s2933_s8, %s1708_s10  ;;  %p1713_p11 = scmp.lt.s32.totalorder %s2933_s8, %s2997_s5 }
 0x199   : > { %p1714_p12 = scmp.lt.s32.totalorder %s1712_s16, %s1708_s10 }
 0x19a   : > { %p1710_p9 = pnand %p1709_p7, %p1872_p3 }
 0x19b   : > { %p1715_p13 = por %p1714_p12, %p1713_p11 }
 0x19c   : > { %p1711_p10 = pneg %p1710_p9 }
 0x19e   : > { %p1716_p0 = pnand %p1715_p13, %p1711_p10 }
 0x1a0   : > { %1719 = shalt.err (!%p1716_p0)
}
 0x1a1   : > { %s1789_s22 = smov 128   ;;  %s1790_s30 = smov 8  }
 0x1a2   : > { %1618 = dma.vmem_to_hbm [thread:$0]  (%p1872_p3), %s2935_s21, 2048, %s2933_s8, %s2941_s29, %s1789_s22, %s1789_s22, %s1790_s30  }
 0x1a3 PF: > { %p1624_p1 = scmp.ge.s32.totalorder %s1786_s25, 2  ;;  %s1415_s9 = sand.u32 1, %s1758_s18  }
 0x1a4   : > { %s1416_s27 = scalar_lea.sflag [#allocation3], %s1415_s9 }
 0x1a5   : > { %p1621_p2 = pnand %p1624_p1, %p1881_p8 }
 0x1a7   : > { %p1622_p4 = pneg %p1621_p2 }
 0x1a9   : > { %1753 = dma.done.wait (%p1622_p4), %s1416_s27, 2048  }
 0x1aa   : > { %1755 = vsyncadd (%p1622_p4), %s1416_s27, 4294965248  ;;  %s18_s25 = sadd.s32 1, %s1786_s25   ;;  %s3036_s6 = sld [smem:[#allocation5_spill]] }
 0x1ab   : > { %p15_p5 = scmp.ge.s32.totalorder %s18_s25, 6   ;;  %s3037_s18 = smov %s1762_s19 }
 0x1ac   : > { %s3038_s19 = smov %s1766_s20  ;;  %s3039_s20 = smov %s1890_s11 }
 0x1ad   : > { %s3040_s21 = smov %s1778_s23  ;;  %s3041_s22 = smov %s1782_s24 }
 0x1ae   : > { %s3042_s23 = smov %s3045_s28  ;;  %17 = sbr.rel (!%p15_p5) target bundleno = 5 (0x5), region = 76 }
 0x1b0   : > { %s3043_s24 = smov %s3036_s6 }
 0x1b3   :  { %1421 = vsyncpa [#allocation3], 1 }
 0x1b4   :  { %1423 = vsyncpa [#allocation3 + $0x1], 1 }

</bundles_post_ra>
